<compile_context>
chip_gen: v6e
topology: v6e:2x2x1
jax: 0.10.0
libtpu: 0.0.40
codegen_flags: <defaults>
</compile_context>

<pallas_src>
import functools

import jax
import jax.numpy as jnp
from jax import lax
from jax.experimental import pallas as pl
from jax.experimental.pallas import tpu as pltpu

_LANE = 128


def _lstm_fc_kernel(gx_ref, whh_ref, wfc_ref, bfc_ref, out_ref, *,
                    hidden_size, seq_len, batch):
    """Single-invocation LSTM recurrence + padded classifier head.

    gx_ref : (T, B, 4H) f32  pre-projected input gates (x_t @ W_ih^T + b_ih + b_hh)
    whh_ref: (H, 4H)   bf16  recurrent weights (transposed)
    wfc_ref: (H, CP)   f32   classifier weights, zero-padded to 128 lanes
    bfc_ref: (1, CP)   f32   classifier bias, zero-padded
    out_ref: (B, CP)   f32   padded logits
    """
    H = hidden_size

    def step(t, carry):
        h, c = carry
        # Only the h-dependent matmul is inside the (unavoidably serial) recurrence.
        # bf16 x bf16 -> f32 accumulate: native MXU operands, half the W_hh VMEM stream.
        gates = gx_ref[t] + jnp.dot(h.astype(jnp.bfloat16), whh_ref[...],
                                    preferred_element_type=jnp.float32)   # (B, 4H)
        # i and f are contiguous lane-aligned slices -> one fused sigmoid.
        i_f = jax.nn.sigmoid(gates[:, 0:2 * H])
        i_g = i_f[:, 0:H]
        f_g = i_f[:, H:2 * H]
        g_g = jnp.tanh(gates[:, 2 * H:3 * H])
        o_g = jax.nn.sigmoid(gates[:, 3 * H:4 * H])

        c_new = f_g * c + i_g * g_g
        h_new = o_g * jnp.tanh(c_new)
        return (h_new, c_new)

    # h / c are one vreg each -> keep them in the loop carry (registers), not VMEM.
    h0 = jnp.zeros((batch, H), jnp.float32)
    c0 = jnp.zeros((batch, H), jnp.float32)
    # Bounded unroll: fully unrolled at small T (LLO overlaps EUP of step t with the
    # MXU push of step t+1) without blowing up code size for long sequences.
    h_T, _ = lax.fori_loop(0, seq_len, step, (h0, c0), unroll=min(seq_len, 8))

    logits = (jnp.dot(h_T, wfc_ref[...], preferred_element_type=jnp.float32)
              + bfc_ref[...])                                             # (B, CP)
    out_ref[...] = logits.astype(out_ref.dtype)


def prepare_params(params):
    """One-time weight preprocessing, hoisted out of the per-call forward.

    Pre-projects the embedding table through W_ih (folding the gate biases), casts the
    recurrent weights to bf16, and pads the classifier head to 128 output lanes.
    """
    emb_table = params["embedding"]                     # (V, E), row 0 zeros
    proj_table = (emb_table @ params["w_ih_t"] + params["b_gates"]).astype(jnp.float32)

    w_fc_t = params["w_fc_t"]                           # (H, C)
    b_fc = params["b_fc"]                               # (1, C)
    H, C = w_fc_t.shape
    CP = max(_LANE, ((C + _LANE - 1) // _LANE) * _LANE)
    w_fc_pad = jnp.zeros((H, CP), jnp.float32).at[:, :C].set(w_fc_t)
    b_fc_pad = jnp.zeros((1, CP), jnp.float32).at[:, :C].set(b_fc)

    return {
        "proj_table": proj_table,                       # (V, 4H) f32
        "w_hh_t_bf16": params["w_hh_t"].astype(jnp.bfloat16),   # (H, 4H) bf16
        "w_fc_pad": w_fc_pad,                           # (H, CP) f32
        "b_fc_pad": b_fc_pad,                           # (1, CP) f32
        "num_classes": C,
    }


def comments_classifier_forward(input_idx, prepared):
    """input_idx: (B, T) int32 token ids. Returns (B, num_classes) float32 logits."""
    proj_table = prepared["proj_table"]
    w_hh_bf16 = prepared["w_hh_t_bf16"]
    w_fc_pad = prepared["w_fc_pad"]
    b_fc_pad = prepared["b_fc_pad"]
    C = prepared["num_classes"]

    B, T = input_idx.shape
    H = w_hh_bf16.shape[0]
    CP = w_fc_pad.shape[1]

    # Gather pre-projected gates directly into (T, B, 4H): no HBM transpose and the
    # non-lane-aligned E=100 dim never reaches the kernel (4H is lane-aligned).
    gx = jnp.take(proj_table, input_idx.T, axis=0)      # (T, B, 4H) f32

    kernel = functools.partial(_lstm_fc_kernel, hidden_size=H, seq_len=T, batch=B)

    out_pad = pl.pallas_call(
        kernel,
        out_shape=jax.ShapeDtypeStruct((B, CP), jnp.float32),
        grid_spec=pltpu.PrefetchScalarGridSpec(
            num_scalar_prefetch=0,
            grid=(1,),
            in_specs=[
                pl.BlockSpec((T, B, 4 * H), lambda i: (0, 0, 0)),   # pre-projected gates
                pl.BlockSpec((H, 4 * H), lambda i: (0, 0)),         # W_hh^T (bf16)
                pl.BlockSpec((H, CP), lambda i: (0, 0)),            # W_fc^T (padded)
                pl.BlockSpec((1, CP), lambda i: (0, 0)),            # fc bias (padded)
            ],
            out_specs=pl.BlockSpec((B, CP), lambda i: (0, 0)),
        ),
        compiler_params=pltpu.CompilerParams(
            dimension_semantics=("arbitrary",),
        ),
    )(gx, w_hh_bf16, w_fc_pad, b_fc_pad)

    return out_pad[:, :C]


def _reference_forward(input_idx, params):
    """Pure-JAX f32 reference mirroring the PyTorch forward."""
    emb = jnp.take(params["embedding"], input_idx, axis=0)     # (B, T, E)
    H = params["w_hh_t"].shape[0]
    B = input_idx.shape[0]

    def step(carry, x_t):
        h, c = carry
        gates = x_t @ params["w_ih_t"] + h @ params["w_hh_t"] + params["b_gates"][0]
        i = jax.nn.sigmoid(gates[:, 0 * H:1 * H])
        f = jax.nn.sigmoid(gates[:, 1 * H:2 * H])
        g = jnp.tanh(gates[:, 2 * H:3 * H])
        o = jax.nn.sigmoid(gates[:, 3 * H:4 * H])
        c = f * c + i * g
        h = o * jnp.tanh(c)
        return (h, c), None

    h0 = jnp.zeros((B, H), jnp.float32)
    c0 = jnp.zeros((B, H), jnp.float32)
    (h_T, _), _ = lax.scan(step, (h0, c0), jnp.transpose(emb, (1, 0, 2)))
    return h_T @ params["w_fc_t"] + params["b_fc"][0]


def make_params(key, vocab_size, embedding_dim, hidden_size, num_classes):
    ks = jax.random.split(key, 7)
    scale = 0.1
    emb = scale * jax.random.normal(ks[0], (vocab_size, embedding_dim), jnp.float32)
    emb = emb.at[0].set(0.0)                                   # padding_idx=0
    w_ih = scale * jax.random.normal(ks[1], (4 * hidden_size, embedding_dim), jnp.float32)
    w_hh = scale * jax.random.normal(ks[2], (4 * hidden_size, hidden_size), jnp.float32)
    b_ih = scale * jax.random.normal(ks[3], (4 * hidden_size,), jnp.float32)
    b_hh = scale * jax.random.normal(ks[4], (4 * hidden_size,), jnp.float32)
    w_fc = scale * jax.random.normal(ks[5], (num_classes, hidden_size), jnp.float32)
    b_fc = scale * jax.random.normal(ks[6], (num_classes,), jnp.float32)
    return {
        "embedding": emb,
        "w_ih_t": w_ih.T,                                      # (E, 4H)
        "w_hh_t": w_hh.T,                                      # (H, 4H)
        "b_gates": (b_ih + b_hh).reshape(1, -1),               # (1, 4H)
        "w_fc_t": w_fc.T,                                      # (H, C)
        "b_fc": b_fc.reshape(1, -1),                           # (1, C)
    }


if __name__ == "__main__":
    # Small, module-consistent shapes: hidden_size=128, embedding_dim=100, num_classes=2.
    VOCAB = 512
    EMB_DIM = 100
    HIDDEN = 128
    NUM_CLASSES = 2
    BATCH = 8
    SEQ = 8

    key = jax.random.PRNGKey(0)
    k_params, k_idx = jax.random.split(key)
    params = make_params(k_params, VOCAB, EMB_DIM, HIDDEN, NUM_CLASSES)
    prepared = prepare_params(params)                          # one-time weight prep
    input_idx = jax.random.randint(k_idx, (BATCH, SEQ), 0, VOCAB, dtype=jnp.int32)

    logits = comments_classifier_forward(input_idx, prepared)
    logits = jax.block_until_ready(logits)

    ref = _reference_forward(input_idx, params)
    assert logits.shape == (BATCH, NUM_CLASSES)
    # bf16 recurrent weights introduce ~1e-3-level absolute error vs. the f32 reference.
    assert jnp.allclose(logits, ref, rtol=1e-2, atol=5e-3), (
        f"mismatch: max abs err {jnp.max(jnp.abs(logits - ref))}")

    print("KERNEL_OK")
</pallas_src>

<mosaic_0001>
module attributes {stable_mosaic.version = 11 : i64} {
  func.func @_lstm_fc_kernel(%arg0: i32, %arg1: memref<8x8x512xf32, #tpu.memory_space<vmem>>, %arg2: memref<128x512xbf16, #tpu.memory_space<vmem>>, %arg3: memref<128x128xf32, #tpu.memory_space<vmem>>, %arg4: memref<1x128xf32, #tpu.memory_space<vmem>>, %arg5: memref<8x128xf32, #tpu.memory_space<vmem>>) attributes {dimension_semantics = [#tpu.dimension_semantics<arbitrary>], iteration_bounds = array<i64: 1>, scalar_prefetch = 0 : i64, scratch_operands = 0 : i64, tpu.core_type = #tpu.core_type<tc>, window_params = [{pipeline_mode = #tpu.pipeline_mode<synchronous>, transform_indices = @transform_0, window_bounds = array<i64: 8, 8, 512>}, {pipeline_mode = #tpu.pipeline_mode<synchronous>, transform_indices = @transform_1, window_bounds = array<i64: 128, 512>}, {pipeline_mode = #tpu.pipeline_mode<synchronous>, transform_indices = @transform_2, window_bounds = array<i64: 128, 128>}, {pipeline_mode = #tpu.pipeline_mode<synchronous>, transform_indices = @transform_3, window_bounds = array<i64: 1, 128>}, {pipeline_mode = #tpu.pipeline_mode<synchronous>, transform_indices = @transform_4, window_bounds = array<i64: 8, 128>}]} {
    %cst = arith.constant 0.000000e+00 : f32
    %0 = vector.broadcast %cst : f32 to vector<8x128xf32>
    %cst_0 = arith.constant 0.000000e+00 : f32
    %1 = vector.broadcast %cst_0 : f32 to vector<8x128xf32>
    %c0_i32 = arith.constant 0 : i32
    %2 = arith.index_cast %c0_i32 : i32 to index
    %c0 = arith.constant 0 : index
    %c0_1 = arith.constant 0 : index
    %3 = vector.load %arg1[%2, %c0, %c0_1] : memref<8x8x512xf32, #tpu.memory_space<vmem>>, vector<1x8x512xf32>
    %4 = vector.shape_cast %3 : vector<1x8x512xf32> to vector<8x512xf32>
    %5 = arith.truncf %0 : vector<8x128xf32> to vector<8x128xbf16>
    %c0_2 = arith.constant 0 : index
    %c0_3 = arith.constant 0 : index
    %6 = vector.load %arg2[%c0_2, %c0_3] : memref<128x512xbf16, #tpu.memory_space<vmem>>, vector<128x512xbf16>
    %cst_4 = arith.constant dense<0.000000e+00> : vector<8x512xf32>
    %7 = tpu.matmul %5, %6, %cst_4 {dimension_numbers = #tpu.dot_dimension_numbers<[1], [0], [0], [1], [0, 0, 1, 1], [], []>} : vector<8x128xbf16>, vector<128x512xbf16>, vector<8x512xf32> -> vector<8x512xf32>
    %8 = arith.addf %4, %7 : vector<8x512xf32>
    %9 = vector.extract_strided_slice %8 {offsets = [0, 0], sizes = [8, 256], strides = [1, 1]} : vector<8x512xf32> to vector<8x256xf32>
    %10 = arith.negf %9 : vector<8x256xf32>
    %11 = math.exp %10 : vector<8x256xf32>
    %cst_5 = arith.constant 1.000000e+00 : f32
    %12 = vector.broadcast %cst_5 : f32 to vector<8x256xf32>
    %13 = arith.addf %12, %11 : vector<8x256xf32>
    %14 = arith.divf %12, %13 : vector<8x256xf32>
    %15 = vector.extract_strided_slice %14 {offsets = [0, 0], sizes = [8, 128], strides = [1, 1]} : vector<8x256xf32> to vector<8x128xf32>
    %16 = vector.extract_strided_slice %14 {offsets = [0, 128], sizes = [8, 128], strides = [1, 1]} : vector<8x256xf32> to vector<8x128xf32>
    %17 = vector.extract_strided_slice %8 {offsets = [0, 256], sizes = [8, 128], strides = [1, 1]} : vector<8x512xf32> to vector<8x128xf32>
    %18 = math.tanh %17 : vector<8x128xf32>
    %19 = vector.extract_strided_slice %8 {offsets = [0, 384], sizes = [8, 128], strides = [1, 1]} : vector<8x512xf32> to vector<8x128xf32>
    %20 = arith.negf %19 : vector<8x128xf32>
    %21 = math.exp %20 : vector<8x128xf32>
    %cst_6 = arith.constant 1.000000e+00 : f32
    %22 = vector.broadcast %cst_6 : f32 to vector<8x128xf32>
    %23 = arith.addf %22, %21 : vector<8x128xf32>
    %24 = arith.divf %22, %23 : vector<8x128xf32>
    %25 = arith.mulf %16, %1 : vector<8x128xf32>
    %26 = arith.mulf %15, %18 : vector<8x128xf32>
    %27 = arith.addf %25, %26 : vector<8x128xf32>
    %28 = math.tanh %27 : vector<8x128xf32>
    %29 = arith.mulf %24, %28 : vector<8x128xf32>
    %c1_i32 = arith.constant 1 : i32
    %30 = arith.index_cast %c1_i32 : i32 to index
    %c0_7 = arith.constant 0 : index
    %c0_8 = arith.constant 0 : index
    %31 = vector.load %arg1[%30, %c0_7, %c0_8] : memref<8x8x512xf32, #tpu.memory_space<vmem>>, vector<1x8x512xf32>
    %32 = vector.shape_cast %31 : vector<1x8x512xf32> to vector<8x512xf32>
    %33 = arith.truncf %29 : vector<8x128xf32> to vector<8x128xbf16>
    %c0_9 = arith.constant 0 : index
    %c0_10 = arith.constant 0 : index
    %34 = vector.load %arg2[%c0_9, %c0_10] : memref<128x512xbf16, #tpu.memory_space<vmem>>, vector<128x512xbf16>
    %cst_11 = arith.constant dense<0.000000e+00> : vector<8x512xf32>
    %35 = tpu.matmul %33, %34, %cst_11 {dimension_numbers = #tpu.dot_dimension_numbers<[1], [0], [0], [1], [0, 0, 1, 1], [], []>} : vector<8x128xbf16>, vector<128x512xbf16>, vector<8x512xf32> -> vector<8x512xf32>
    %36 = arith.addf %32, %35 : vector<8x512xf32>
    %37 = vector.extract_strided_slice %36 {offsets = [0, 0], sizes = [8, 256], strides = [1, 1]} : vector<8x512xf32> to vector<8x256xf32>
    %38 = arith.negf %37 : vector<8x256xf32>
    %39 = math.exp %38 : vector<8x256xf32>
    %cst_12 = arith.constant 1.000000e+00 : f32
    %40 = vector.broadcast %cst_12 : f32 to vector<8x256xf32>
    %41 = arith.addf %40, %39 : vector<8x256xf32>
    %42 = arith.divf %40, %41 : vector<8x256xf32>
    %43 = vector.extract_strided_slice %42 {offsets = [0, 0], sizes = [8, 128], strides = [1, 1]} : vector<8x256xf32> to vector<8x128xf32>
    %44 = vector.extract_strided_slice %42 {offsets = [0, 128], sizes = [8, 128], strides = [1, 1]} : vector<8x256xf32> to vector<8x128xf32>
    %45 = vector.extract_strided_slice %36 {offsets = [0, 256], sizes = [8, 128], strides = [1, 1]} : vector<8x512xf32> to vector<8x128xf32>
    %46 = math.tanh %45 : vector<8x128xf32>
    %47 = vector.extract_strided_slice %36 {offsets = [0, 384], sizes = [8, 128], strides = [1, 1]} : vector<8x512xf32> to vector<8x128xf32>
    %48 = arith.negf %47 : vector<8x128xf32>
    %49 = math.exp %48 : vector<8x128xf32>
    %cst_13 = arith.constant 1.000000e+00 : f32
    %50 = vector.broadcast %cst_13 : f32 to vector<8x128xf32>
    %51 = arith.addf %50, %49 : vector<8x128xf32>
    %52 = arith.divf %50, %51 : vector<8x128xf32>
    %53 = arith.mulf %44, %27 : vector<8x128xf32>
    %54 = arith.mulf %43, %46 : vector<8x128xf32>
    %55 = arith.addf %53, %54 : vector<8x128xf32>
    %56 = math.tanh %55 : vector<8x128xf32>
    %57 = arith.mulf %52, %56 : vector<8x128xf32>
    %c2_i32 = arith.constant 2 : i32
    %58 = arith.index_cast %c2_i32 : i32 to index
    %c0_14 = arith.constant 0 : index
    %c0_15 = arith.constant 0 : index
    %59 = vector.load %arg1[%58, %c0_14, %c0_15] : memref<8x8x512xf32, #tpu.memory_space<vmem>>, vector<1x8x512xf32>
    %60 = vector.shape_cast %59 : vector<1x8x512xf32> to vector<8x512xf32>
    %61 = arith.truncf %57 : vector<8x128xf32> to vector<8x128xbf16>
    %c0_16 = arith.constant 0 : index
    %c0_17 = arith.constant 0 : index
    %62 = vector.load %arg2[%c0_16, %c0_17] : memref<128x512xbf16, #tpu.memory_space<vmem>>, vector<128x512xbf16>
    %cst_18 = arith.constant dense<0.000000e+00> : vector<8x512xf32>
    %63 = tpu.matmul %61, %62, %cst_18 {dimension_numbers = #tpu.dot_dimension_numbers<[1], [0], [0], [1], [0, 0, 1, 1], [], []>} : vector<8x128xbf16>, vector<128x512xbf16>, vector<8x512xf32> -> vector<8x512xf32>
    %64 = arith.addf %60, %63 : vector<8x512xf32>
    %65 = vector.extract_strided_slice %64 {offsets = [0, 0], sizes = [8, 256], strides = [1, 1]} : vector<8x512xf32> to vector<8x256xf32>
    %66 = arith.negf %65 : vector<8x256xf32>
    %67 = math.exp %66 : vector<8x256xf32>
    %cst_19 = arith.constant 1.000000e+00 : f32
    %68 = vector.broadcast %cst_19 : f32 to vector<8x256xf32>
    %69 = arith.addf %68, %67 : vector<8x256xf32>
    %70 = arith.divf %68, %69 : vector<8x256xf32>
    %71 = vector.extract_strided_slice %70 {offsets = [0, 0], sizes = [8, 128], strides = [1, 1]} : vector<8x256xf32> to vector<8x128xf32>
    %72 = vector.extract_strided_slice %70 {offsets = [0, 128], sizes = [8, 128], strides = [1, 1]} : vector<8x256xf32> to vector<8x128xf32>
    %73 = vector.extract_strided_slice %64 {offsets = [0, 256], sizes = [8, 128], strides = [1, 1]} : vector<8x512xf32> to vector<8x128xf32>
    %74 = math.tanh %73 : vector<8x128xf32>
    %75 = vector.extract_strided_slice %64 {offsets = [0, 384], sizes = [8, 128], strides = [1, 1]} : vector<8x512xf32> to vector<8x128xf32>
    %76 = arith.negf %75 : vector<8x128xf32>
    %77 = math.exp %76 : vector<8x128xf32>
    %cst_20 = arith.constant 1.000000e+00 : f32
    %78 = vector.broadcast %cst_20 : f32 to vector<8x128xf32>
    %79 = arith.addf %78, %77 : vector<8x128xf32>
    %80 = arith.divf %78, %79 : vector<8x128xf32>
    %81 = arith.mulf %72, %55 : vector<8x128xf32>
    %82 = arith.mulf %71, %74 : vector<8x128xf32>
    %83 = arith.addf %81, %82 : vector<8x128xf32>
    %84 = math.tanh %83 : vector<8x128xf32>
    %85 = arith.mulf %80, %84 : vector<8x128xf32>
    %c3_i32 = arith.constant 3 : i32
    %86 = arith.index_cast %c3_i32 : i32 to index
    %c0_21 = arith.constant 0 : index
    %c0_22 = arith.constant 0 : index
    %87 = vector.load %arg1[%86, %c0_21, %c0_22] : memref<8x8x512xf32, #tpu.memory_space<vmem>>, vector<1x8x512xf32>
    %88 = vector.shape_cast %87 : vector<1x8x512xf32> to vector<8x512xf32>
    %89 = arith.truncf %85 : vector<8x128xf32> to vector<8x128xbf16>
    %c0_23 = arith.constant 0 : index
    %c0_24 = arith.constant 0 : index
    %90 = vector.load %arg2[%c0_23, %c0_24] : memref<128x512xbf16, #tpu.memory_space<vmem>>, vector<128x512xbf16>
    %cst_25 = arith.constant dense<0.000000e+00> : vector<8x512xf32>
    %91 = tpu.matmul %89, %90, %cst_25 {dimension_numbers = #tpu.dot_dimension_numbers<[1], [0], [0], [1], [0, 0, 1, 1], [], []>} : vector<8x128xbf16>, vector<128x512xbf16>, vector<8x512xf32> -> vector<8x512xf32>
    %92 = arith.addf %88, %91 : vector<8x512xf32>
    %93 = vector.extract_strided_slice %92 {offsets = [0, 0], sizes = [8, 256], strides = [1, 1]} : vector<8x512xf32> to vector<8x256xf32>
    %94 = arith.negf %93 : vector<8x256xf32>
    %95 = math.exp %94 : vector<8x256xf32>
    %cst_26 = arith.constant 1.000000e+00 : f32
    %96 = vector.broadcast %cst_26 : f32 to vector<8x256xf32>
    %97 = arith.addf %96, %95 : vector<8x256xf32>
    %98 = arith.divf %96, %97 : vector<8x256xf32>
    %99 = vector.extract_strided_slice %98 {offsets = [0, 0], sizes = [8, 128], strides = [1, 1]} : vector<8x256xf32> to vector<8x128xf32>
    %100 = vector.extract_strided_slice %98 {offsets = [0, 128], sizes = [8, 128], strides = [1, 1]} : vector<8x256xf32> to vector<8x128xf32>
    %101 = vector.extract_strided_slice %92 {offsets = [0, 256], sizes = [8, 128], strides = [1, 1]} : vector<8x512xf32> to vector<8x128xf32>
    %102 = math.tanh %101 : vector<8x128xf32>
    %103 = vector.extract_strided_slice %92 {offsets = [0, 384], sizes = [8, 128], strides = [1, 1]} : vector<8x512xf32> to vector<8x128xf32>
    %104 = arith.negf %103 : vector<8x128xf32>
    %105 = math.exp %104 : vector<8x128xf32>
    %cst_27 = arith.constant 1.000000e+00 : f32
    %106 = vector.broadcast %cst_27 : f32 to vector<8x128xf32>
    %107 = arith.addf %106, %105 : vector<8x128xf32>
    %108 = arith.divf %106, %107 : vector<8x128xf32>
    %109 = arith.mulf %100, %83 : vector<8x128xf32>
    %110 = arith.mulf %99, %102 : vector<8x128xf32>
    %111 = arith.addf %109, %110 : vector<8x128xf32>
    %112 = math.tanh %111 : vector<8x128xf32>
    %113 = arith.mulf %108, %112 : vector<8x128xf32>
    %c4_i32 = arith.constant 4 : i32
    %114 = arith.index_cast %c4_i32 : i32 to index
    %c0_28 = arith.constant 0 : index
    %c0_29 = arith.constant 0 : index
    %115 = vector.load %arg1[%114, %c0_28, %c0_29] : memref<8x8x512xf32, #tpu.memory_space<vmem>>, vector<1x8x512xf32>
    %116 = vector.shape_cast %115 : vector<1x8x512xf32> to vector<8x512xf32>
    %117 = arith.truncf %113 : vector<8x128xf32> to vector<8x128xbf16>
    %c0_30 = arith.constant 0 : index
    %c0_31 = arith.constant 0 : index
    %118 = vector.load %arg2[%c0_30, %c0_31] : memref<128x512xbf16, #tpu.memory_space<vmem>>, vector<128x512xbf16>
    %cst_32 = arith.constant dense<0.000000e+00> : vector<8x512xf32>
    %119 = tpu.matmul %117, %118, %cst_32 {dimension_numbers = #tpu.dot_dimension_numbers<[1], [0], [0], [1], [0, 0, 1, 1], [], []>} : vector<8x128xbf16>, vector<128x512xbf16>, vector<8x512xf32> -> vector<8x512xf32>
    %120 = arith.addf %116, %119 : vector<8x512xf32>
    %121 = vector.extract_strided_slice %120 {offsets = [0, 0], sizes = [8, 256], strides = [1, 1]} : vector<8x512xf32> to vector<8x256xf32>
    %122 = arith.negf %121 : vector<8x256xf32>
    %123 = math.exp %122 : vector<8x256xf32>
    %cst_33 = arith.constant 1.000000e+00 : f32
    %124 = vector.broadcast %cst_33 : f32 to vector<8x256xf32>
    %125 = arith.addf %124, %123 : vector<8x256xf32>
    %126 = arith.divf %124, %125 : vector<8x256xf32>
    %127 = vector.extract_strided_slice %126 {offsets = [0, 0], sizes = [8, 128], strides = [1, 1]} : vector<8x256xf32> to vector<8x128xf32>
    %128 = vector.extract_strided_slice %126 {offsets = [0, 128], sizes = [8, 128], strides = [1, 1]} : vector<8x256xf32> to vector<8x128xf32>
    %129 = vector.extract_strided_slice %120 {offsets = [0, 256], sizes = [8, 128], strides = [1, 1]} : vector<8x512xf32> to vector<8x128xf32>
    %130 = math.tanh %129 : vector<8x128xf32>
    %131 = vector.extract_strided_slice %120 {offsets = [0, 384], sizes = [8, 128], strides = [1, 1]} : vector<8x512xf32> to vector<8x128xf32>
    %132 = arith.negf %131 : vector<8x128xf32>
    %133 = math.exp %132 : vector<8x128xf32>
    %cst_34 = arith.constant 1.000000e+00 : f32
    %134 = vector.broadcast %cst_34 : f32 to vector<8x128xf32>
    %135 = arith.addf %134, %133 : vector<8x128xf32>
    %136 = arith.divf %134, %135 : vector<8x128xf32>
    %137 = arith.mulf %128, %111 : vector<8x128xf32>
    %138 = arith.mulf %127, %130 : vector<8x128xf32>
    %139 = arith.addf %137, %138 : vector<8x128xf32>
    %140 = math.tanh %139 : vector<8x128xf32>
    %141 = arith.mulf %136, %140 : vector<8x128xf32>
    %c5_i32 = arith.constant 5 : i32
    %142 = arith.index_cast %c5_i32 : i32 to index
    %c0_35 = arith.constant 0 : index
    %c0_36 = arith.constant 0 : index
    %143 = vector.load %arg1[%142, %c0_35, %c0_36] : memref<8x8x512xf32, #tpu.memory_space<vmem>>, vector<1x8x512xf32>
    %144 = vector.shape_cast %143 : vector<1x8x512xf32> to vector<8x512xf32>
    %145 = arith.truncf %141 : vector<8x128xf32> to vector<8x128xbf16>
    %c0_37 = arith.constant 0 : index
    %c0_38 = arith.constant 0 : index
    %146 = vector.load %arg2[%c0_37, %c0_38] : memref<128x512xbf16, #tpu.memory_space<vmem>>, vector<128x512xbf16>
    %cst_39 = arith.constant dense<0.000000e+00> : vector<8x512xf32>
    %147 = tpu.matmul %145, %146, %cst_39 {dimension_numbers = #tpu.dot_dimension_numbers<[1], [0], [0], [1], [0, 0, 1, 1], [], []>} : vector<8x128xbf16>, vector<128x512xbf16>, vector<8x512xf32> -> vector<8x512xf32>
    %148 = arith.addf %144, %147 : vector<8x512xf32>
    %149 = vector.extract_strided_slice %148 {offsets = [0, 0], sizes = [8, 256], strides = [1, 1]} : vector<8x512xf32> to vector<8x256xf32>
    %150 = arith.negf %149 : vector<8x256xf32>
    %151 = math.exp %150 : vector<8x256xf32>
    %cst_40 = arith.constant 1.000000e+00 : f32
    %152 = vector.broadcast %cst_40 : f32 to vector<8x256xf32>
    %153 = arith.addf %152, %151 : vector<8x256xf32>
    %154 = arith.divf %152, %153 : vector<8x256xf32>
    %155 = vector.extract_strided_slice %154 {offsets = [0, 0], sizes = [8, 128], strides = [1, 1]} : vector<8x256xf32> to vector<8x128xf32>
    %156 = vector.extract_strided_slice %154 {offsets = [0, 128], sizes = [8, 128], strides = [1, 1]} : vector<8x256xf32> to vector<8x128xf32>
    %157 = vector.extract_strided_slice %148 {offsets = [0, 256], sizes = [8, 128], strides = [1, 1]} : vector<8x512xf32> to vector<8x128xf32>
    %158 = math.tanh %157 : vector<8x128xf32>
    %159 = vector.extract_strided_slice %148 {offsets = [0, 384], sizes = [8, 128], strides = [1, 1]} : vector<8x512xf32> to vector<8x128xf32>
    %160 = arith.negf %159 : vector<8x128xf32>
    %161 = math.exp %160 : vector<8x128xf32>
    %cst_41 = arith.constant 1.000000e+00 : f32
    %162 = vector.broadcast %cst_41 : f32 to vector<8x128xf32>
    %163 = arith.addf %162, %161 : vector<8x128xf32>
    %164 = arith.divf %162, %163 : vector<8x128xf32>
    %165 = arith.mulf %156, %139 : vector<8x128xf32>
    %166 = arith.mulf %155, %158 : vector<8x128xf32>
    %167 = arith.addf %165, %166 : vector<8x128xf32>
    %168 = math.tanh %167 : vector<8x128xf32>
    %169 = arith.mulf %164, %168 : vector<8x128xf32>
    %c6_i32 = arith.constant 6 : i32
    %170 = arith.index_cast %c6_i32 : i32 to index
    %c0_42 = arith.constant 0 : index
    %c0_43 = arith.constant 0 : index
    %171 = vector.load %arg1[%170, %c0_42, %c0_43] : memref<8x8x512xf32, #tpu.memory_space<vmem>>, vector<1x8x512xf32>
    %172 = vector.shape_cast %171 : vector<1x8x512xf32> to vector<8x512xf32>
    %173 = arith.truncf %169 : vector<8x128xf32> to vector<8x128xbf16>
    %c0_44 = arith.constant 0 : index
    %c0_45 = arith.constant 0 : index
    %174 = vector.load %arg2[%c0_44, %c0_45] : memref<128x512xbf16, #tpu.memory_space<vmem>>, vector<128x512xbf16>
    %cst_46 = arith.constant dense<0.000000e+00> : vector<8x512xf32>
    %175 = tpu.matmul %173, %174, %cst_46 {dimension_numbers = #tpu.dot_dimension_numbers<[1], [0], [0], [1], [0, 0, 1, 1], [], []>} : vector<8x128xbf16>, vector<128x512xbf16>, vector<8x512xf32> -> vector<8x512xf32>
    %176 = arith.addf %172, %175 : vector<8x512xf32>
    %177 = vector.extract_strided_slice %176 {offsets = [0, 0], sizes = [8, 256], strides = [1, 1]} : vector<8x512xf32> to vector<8x256xf32>
    %178 = arith.negf %177 : vector<8x256xf32>
    %179 = math.exp %178 : vector<8x256xf32>
    %cst_47 = arith.constant 1.000000e+00 : f32
    %180 = vector.broadcast %cst_47 : f32 to vector<8x256xf32>
    %181 = arith.addf %180, %179 : vector<8x256xf32>
    %182 = arith.divf %180, %181 : vector<8x256xf32>
    %183 = vector.extract_strided_slice %182 {offsets = [0, 0], sizes = [8, 128], strides = [1, 1]} : vector<8x256xf32> to vector<8x128xf32>
    %184 = vector.extract_strided_slice %182 {offsets = [0, 128], sizes = [8, 128], strides = [1, 1]} : vector<8x256xf32> to vector<8x128xf32>
    %185 = vector.extract_strided_slice %176 {offsets = [0, 256], sizes = [8, 128], strides = [1, 1]} : vector<8x512xf32> to vector<8x128xf32>
    %186 = math.tanh %185 : vector<8x128xf32>
    %187 = vector.extract_strided_slice %176 {offsets = [0, 384], sizes = [8, 128], strides = [1, 1]} : vector<8x512xf32> to vector<8x128xf32>
    %188 = arith.negf %187 : vector<8x128xf32>
    %189 = math.exp %188 : vector<8x128xf32>
    %cst_48 = arith.constant 1.000000e+00 : f32
    %190 = vector.broadcast %cst_48 : f32 to vector<8x128xf32>
    %191 = arith.addf %190, %189 : vector<8x128xf32>
    %192 = arith.divf %190, %191 : vector<8x128xf32>
    %193 = arith.mulf %184, %167 : vector<8x128xf32>
    %194 = arith.mulf %183, %186 : vector<8x128xf32>
    %195 = arith.addf %193, %194 : vector<8x128xf32>
    %196 = math.tanh %195 : vector<8x128xf32>
    %197 = arith.mulf %192, %196 : vector<8x128xf32>
    %c7_i32 = arith.constant 7 : i32
    %198 = arith.index_cast %c7_i32 : i32 to index
    %c0_49 = arith.constant 0 : index
    %c0_50 = arith.constant 0 : index
    %199 = vector.load %arg1[%198, %c0_49, %c0_50] : memref<8x8x512xf32, #tpu.memory_space<vmem>>, vector<1x8x512xf32>
    %200 = vector.shape_cast %199 : vector<1x8x512xf32> to vector<8x512xf32>
    %201 = arith.truncf %197 : vector<8x128xf32> to vector<8x128xbf16>
    %c0_51 = arith.constant 0 : index
    %c0_52 = arith.constant 0 : index
    %202 = vector.load %arg2[%c0_51, %c0_52] : memref<128x512xbf16, #tpu.memory_space<vmem>>, vector<128x512xbf16>
    %cst_53 = arith.constant dense<0.000000e+00> : vector<8x512xf32>
    %203 = tpu.matmul %201, %202, %cst_53 {dimension_numbers = #tpu.dot_dimension_numbers<[1], [0], [0], [1], [0, 0, 1, 1], [], []>} : vector<8x128xbf16>, vector<128x512xbf16>, vector<8x512xf32> -> vector<8x512xf32>
    %204 = arith.addf %200, %203 : vector<8x512xf32>
    %205 = vector.extract_strided_slice %204 {offsets = [0, 0], sizes = [8, 256], strides = [1, 1]} : vector<8x512xf32> to vector<8x256xf32>
    %206 = arith.negf %205 : vector<8x256xf32>
    %207 = math.exp %206 : vector<8x256xf32>
    %cst_54 = arith.constant 1.000000e+00 : f32
    %208 = vector.broadcast %cst_54 : f32 to vector<8x256xf32>
    %209 = arith.addf %208, %207 : vector<8x256xf32>
    %210 = arith.divf %208, %209 : vector<8x256xf32>
    %211 = vector.extract_strided_slice %210 {offsets = [0, 0], sizes = [8, 128], strides = [1, 1]} : vector<8x256xf32> to vector<8x128xf32>
    %212 = vector.extract_strided_slice %210 {offsets = [0, 128], sizes = [8, 128], strides = [1, 1]} : vector<8x256xf32> to vector<8x128xf32>
    %213 = vector.extract_strided_slice %204 {offsets = [0, 256], sizes = [8, 128], strides = [1, 1]} : vector<8x512xf32> to vector<8x128xf32>
    %214 = math.tanh %213 : vector<8x128xf32>
    %215 = vector.extract_strided_slice %204 {offsets = [0, 384], sizes = [8, 128], strides = [1, 1]} : vector<8x512xf32> to vector<8x128xf32>
    %216 = arith.negf %215 : vector<8x128xf32>
    %217 = math.exp %216 : vector<8x128xf32>
    %cst_55 = arith.constant 1.000000e+00 : f32
    %218 = vector.broadcast %cst_55 : f32 to vector<8x128xf32>
    %219 = arith.addf %218, %217 : vector<8x128xf32>
    %220 = arith.divf %218, %219 : vector<8x128xf32>
    %221 = arith.mulf %212, %195 : vector<8x128xf32>
    %222 = arith.mulf %211, %214 : vector<8x128xf32>
    %223 = arith.addf %221, %222 : vector<8x128xf32>
    %224 = math.tanh %223 : vector<8x128xf32>
    %225 = arith.mulf %220, %224 : vector<8x128xf32>
    %c8_i32 = arith.constant 8 : i32
    %c0_56 = arith.constant 0 : index
    %c0_57 = arith.constant 0 : index
    %226 = vector.load %arg3[%c0_56, %c0_57] : memref<128x128xf32, #tpu.memory_space<vmem>>, vector<128x128xf32>
    %cst_58 = arith.constant dense<0.000000e+00> : vector<8x128xf32>
    %227 = tpu.matmul %225, %226, %cst_58 {dimension_numbers = #tpu.dot_dimension_numbers<[1], [0], [0], [1], [0, 0, 1, 1], [], []>} : vector<8x128xf32>, vector<128x128xf32>, vector<8x128xf32> -> vector<8x128xf32>
    %c0_59 = arith.constant 0 : index
    %c0_60 = arith.constant 0 : index
    %228 = vector.load %arg4[%c0_59, %c0_60] : memref<1x128xf32, #tpu.memory_space<vmem>>, vector<1x128xf32>
    %229 = vector.broadcast %228 : vector<1x128xf32> to vector<8x128xf32>
    %230 = arith.addf %227, %229 : vector<8x128xf32>
    %c0_61 = arith.constant 0 : index
    %c0_62 = arith.constant 0 : index
    %231 = vector.load %arg5[%c0_61, %c0_62] : memref<8x128xf32, #tpu.memory_space<vmem>>, vector<8x128xf32>
    tpu.vector_store %arg5[%c0_61, %c0_62], %230 {strides = array<i32>} : memref<8x128xf32, #tpu.memory_space<vmem>>, vector<8x128xf32>,
    return
  }
  func.func @transform_0(%arg0: i32) -> (i32, i32, i32) {
    %c0_i32 = arith.constant 0 : i32
    %c0_i32_0 = arith.constant 0 : i32
    %c0_i32_1 = arith.constant 0 : i32
    %c0_i32_2 = arith.constant 0 : i32
    return %c0_i32, %c0_i32_0, %c0_i32_1 : i32, i32, i32
  }
  func.func @transform_1(%arg0: i32) -> (i32, i32) {
    %c0_i32 = arith.constant 0 : i32
    %c0_i32_0 = arith.constant 0 : i32
    %c0_i32_1 = arith.constant 0 : i32
    return %c0_i32, %c0_i32_0 : i32, i32
  }
  func.func @transform_2(%arg0: i32) -> (i32, i32) {
    %c0_i32 = arith.constant 0 : i32
    %c0_i32_0 = arith.constant 0 : i32
    %c0_i32_1 = arith.constant 0 : i32
    return %c0_i32, %c0_i32_0 : i32, i32
  }
  func.func @transform_3(%arg0: i32) -> (i32, i32) {
    %c0_i32 = arith.constant 0 : i32
    %c0_i32_0 = arith.constant 0 : i32
    %c0_i32_1 = arith.constant 0 : i32
    return %c0_i32, %c0_i32_0 : i32, i32
  }
  func.func @transform_4(%arg0: i32) -> (i32, i32) {
    %c0_i32 = arith.constant 0 : i32
    %c0_i32_0 = arith.constant 0 : i32
    %c0_i32_1 = arith.constant 0 : i32
    return %c0_i32, %c0_i32_0 : i32, i32
  }
}

</mosaic_0001>

<bundles_post_ra>
// kernel: tpu_custom_call.1
= control target key start
LH: loop header
LB: loop body
LE: loop exit
PB: predicated region body
PF: predicated region fallthrough
CT: control target
= control target key end

     0   :  { %9 = vsyncpa [#allocation3], 0  ;;  %s2091_s0 = inlined_call_operand.hbm [shape: f32[8,8,512], index: 0, kind: input, shape index: {}]   ;;  %s2092_s1 = inlined_call_operand.hbm [shape: bf16[128,512], index: 1, kind: input, shape index: {}]   ;;  %s2093_s2 = inlined_call_operand.hbm [shape: f32[128,128], index: 2, kind: input, shape index: {}]   ;;  %s2094_s3 = inlined_call_operand.vmem [shape: f32[1,128], index: 3, kind: input, shape index: {}]   ;;  %s2095_s4 = inlined_call_operand.hbm [shape: f32[8,128], index: 4, kind: output, shape index: {}]  }
   0x1   :  { %10 = vsyncpa [#allocation6], 0 }
   0x2   :  { %11 = vsyncpa [#allocation4], 0  ;;  %s1703_s15 = smov [#allocation5]  }
   0x3   :  { %s29_s16 = sshll.u32 %s1703_s15, 4  ;;  %s30_s16 = int_to_ptr.vmem [resolvable:$true] %s29_s16 }
   0x4   :  { %s1625_s17 = scalar_lea.vmem %s30_s16, 4096  ;;  %p1630_p1 = scmp.lt.s32.totalorder %s30_s16, %s30_s16 }
   0x5   :  { %p1626_p0 = scmp.ne.s32.totalorder %s30_s16, %s1625_s17  ;;  %p1631_p2 = scmp.lt.s32.totalorder %s1625_s17, %s1625_s17 }
   0x7   :  { %p1632_p3 = por %p1631_p2, %p1630_p1 }
   0x9   :  { %p1633_p4 = pnand %p1632_p3, %p1626_p0 }
   0xb   :  { %1636 = shalt.err (!%p1633_p4)
}
   0xc   :  { %s1704_s18 = smov 256   ;;  %s1705_s19 = smov 16  }
   0xd   :  { %35 = dma.hbm_to_vmem [thread:$0]  %s2092_s1, 4096, %s30_s16, [#allocation6], %s1704_s18, %s1704_s18, %s1705_s19  }
   0xe   :  { %s1706_s22 = smov [#allocation2]  }
   0xf   :  { %s17_s23 = sshll.u32 %s1706_s22, 4  ;;  %s18_s23 = int_to_ptr.vmem [resolvable:$true] %s17_s23 }
  0x10   :  { %s1645_s24 = scalar_lea.vmem %s18_s23, 4096  ;;  %p1650_p6 = scmp.lt.s32.totalorder %s18_s23, %s18_s23 }
  0x11   :  { %p1646_p5 = scmp.ne.s32.totalorder %s18_s23, %s1645_s24  ;;  %p1651_p7 = scmp.lt.s32.totalorder %s1645_s24, %s1645_s24 }
  0x13   :  { %p1652_p8 = por %p1651_p7, %p1650_p6 }
  0x15   :  { %p1653_p9 = pnand %p1652_p8, %p1646_p5 }
  0x17   :  { %1656 = shalt.err (!%p1653_p9)
}
  0x18   :  { %s1707_s25 = smov 512   ;;  %s1708_s26 = smov 32  }
  0x19   :  { %23 = dma.hbm_to_vmem [thread:$0]  %s2091_s0, 4096, %s18_s23, [#allocation3], %s1707_s25, %s1707_s25, %s1708_s26  }
  0x1a   :  { %s1709_s29 = smov [#allocation7]  }
  0x1b   :  { %s41_s30 = sshll.u32 %s1709_s29, 4  ;;  %s42_s30 = int_to_ptr.vmem [resolvable:$true] %s41_s30 }
  0x1c   :  { %s1665_s1 = scalar_lea.vmem %s42_s30, 2048  ;;  %p1670_p11 = scmp.lt.s32.totalorder %s42_s30, %s42_s30 }
  0x1d   :  { %p1666_p10 = scmp.ne.s32.totalorder %s42_s30, %s1665_s1  ;;  %p1671_p12 = scmp.lt.s32.totalorder %s1665_s1, %s1665_s1 }
  0x1f   :  { %p1672_p13 = por %p1671_p12, %p1670_p11 }
  0x21   :  { %p1673_p0 = pnand %p1672_p13, %p1666_p10 }
  0x23   :  { %1676 = shalt.err (!%p1673_p0)
}
  0x24   :  { %s1710_s5 = smov 128   ;;  %s1711_s6 = smov 8  }
  0x25   :  { %47 = dma.hbm_to_vmem [thread:$0]  %s2093_s2, 2048, %s42_s30, [#allocation6], %s1710_s5, %s1710_s5, %s1711_s6  }
  0x26   :  { %1697 = dma.done.wait [#allocation3], 4096  }
  0x27   :  { %1698 = vsyncadd [#allocation3], 4294963200 }
  0x28   :  { %1699 = dma.done.wait [#allocation6], 6144  }
  0x29   :  { %1700 = vsyncadd [#allocation6], 4294961152  ;;  %v1712_v0 = vmov 0   ;;  %v1752_v1 = vld [vmem:[#allocation5 + $0xe4] ss:$16 sps:$4 sm:$0xff]   ;;  %v61_v35 = vld [vmem:[#allocation2 + $0x8] sm:$0xff] }
  0x2a   :  { %288 = vmatprep.mubr.bf16.mxu0 %v1712_v0  ;;  %329 = vmatprep.mubr.bf16.mxu1 %v1712_v0  ;;  %v1754_v2 = vld [vmem:[#allocation5 + $0xe0] ss:$16 sps:$4 sm:$0xff]   ;;  %v1757_v3 = vld [vmem:[#allocation5 + $0xc4] ss:$16 sps:$4 sm:$0xff]   ;;  %v1765_v6 = vld [vmem:[#allocation5 + $0xec] ss:$16 sps:$4 sm:$0xff]  }
  0x2b   :  { %256 = vmatprep.subr.bf16.mxu0 %v1752_v1  ;;  %v1760_v4 = vld [vmem:[#allocation5 + $0xc0] ss:$16 sps:$4 sm:$0xff]   ;;  %v1763_v5 = vld [vmem:[#allocation5 + $0xa4] ss:$16 sps:$4 sm:$0xff]   ;;  %v1767_v7 = vld [vmem:[#allocation5 + $0xe8] ss:$16 sps:$4 sm:$0xff]   ;;  %297 = vmatprep.subr.bf16.mxu1 %v1765_v6 }
  0x2c   :  { %257 = vmatpush1.bf16.msra.mxu0 %v1754_v2  ;;  %v1770_v8 = vld [vmem:[#allocation5 + $0xa0] ss:$16 sps:$4 sm:$0xff]   ;;  %v1774_v9 = vld [vmem:[#allocation5 + $0x84] ss:$16 sps:$4 sm:$0xff]   ;;  %298 = vmatpush1.bf16.msra.mxu1 %v1767_v7  ;;  %v1777_v10 = vld [vmem:[#allocation5 + $0xcc] ss:$16 sps:$4 sm:$0xff]  }
  0x2d   :  { %258 = vmatprep.subr.bf16.mxu0 %v1757_v3  ;;  %v1779_v11 = vld [vmem:[#allocation5 + $0xc8] ss:$16 sps:$4 sm:$0xff]   ;;  %299 = vmatprep.subr.bf16.mxu1 %v1777_v10  ;;  %v1783_v12 = vld [vmem:[#allocation5 + $0x80] ss:$16 sps:$4 sm:$0xff]   ;;  %v1785_v13 = vld [vmem:[#allocation5 + $0x64] ss:$16 sps:$4 sm:$0xff]  }
  0x2e   :  { %v1787_v14 = vld [vmem:[#allocation5 + $0xac] ss:$16 sps:$4 sm:$0xff]   ;;  %v1791_v15 = vld [vmem:[#allocation5 + $0xa8] ss:$16 sps:$4 sm:$0xff]   ;;  %v1797_v17 = vld [vmem:[#allocation5 + $0x60] ss:$16 sps:$4 sm:$0xff]  }
  0x2f   :  { %v1794_v16 = vld [vmem:[#allocation5 + $0x8c] ss:$16 sps:$4 sm:$0xff]   ;;  %v1800_v18 = vld [vmem:[#allocation5 + $0x44] ss:$16 sps:$4 sm:$0xff]   ;;  %v1803_v19 = vld [vmem:[#allocation5 + $0x88] ss:$16 sps:$4 sm:$0xff]  }
  0x30   :  { %259 = vmatpush1.bf16.msra.mxu0 %v1760_v4  ;;  %300 = vmatpush1.bf16.msra.mxu1 %v1779_v11  ;;  %v1806_v20 = vld [vmem:[#allocation5 + $0x6c] ss:$16 sps:$4 sm:$0xff]   ;;  %v1809_v21 = vld [vmem:[#allocation5 + $0x40] ss:$16 sps:$4 sm:$0xff]   ;;  %v1811_v22 = vld [vmem:[#allocation5 + $0x24] ss:$16 sps:$4 sm:$0xff]  }
  0x31   :  { %260 = vmatprep.subr.bf16.mxu0 %v1763_v5  ;;  %301 = vmatprep.subr.bf16.mxu1 %v1787_v14  ;;  %v1815_v23 = vld [vmem:[#allocation5 + $0x68] ss:$16 sps:$4 sm:$0xff]   ;;  %v1818_v24 = vld [vmem:[#allocation5 + $0x4c] ss:$16 sps:$4 sm:$0xff]   ;;  %v1821_v25 = vld [vmem:[#allocation5 + $0x20] ss:$16 sps:$4 sm:$0xff]  }
  0x32   :  { %v1824_v26 = vld [vmem:[#allocation5 + $0x4] ss:$16 sps:$4 sm:$0xff]   ;;  %v1827_v27 = vld [vmem:[#allocation5 + $0x48] ss:$16 sps:$4 sm:$0xff]   ;;  %v1830_v28 = vld [vmem:[#allocation5 + $0x2c] ss:$16 sps:$4 sm:$0xff]  }
  0x33   :  { %v1833_v29 = vld [vmem:[#allocation5] ss:$16 sps:$4 sm:$0xff]   ;;  %v1837_v30 = vld [vmem:[#allocation5 + $0x28] ss:$16 sps:$4 sm:$0xff]   ;;  %v1840_v31 = vld [vmem:[#allocation5 + $0xc] ss:$16 sps:$4 sm:$0xff]  }
  0x34   :  { %261 = vmatpush1.bf16.msra.mxu0 %v1770_v8  ;;  %302 = vmatpush1.bf16.msra.mxu1 %v1791_v15  ;;  %v1844_v32 = vld [vmem:[#allocation5 + $0x8] ss:$16 sps:$4 sm:$0xff]   ;;  %v60_v33 = vld [vmem:[#allocation2] sm:$0xff]  ;;  %v62_v48 = vld [vmem:[#allocation2 + $0x10] sm:$0xff]  ;;  %vm1714_vm0 = vmmov 0   ;;  %s1715_s9 = smov [#allocation8]  }
  0x35   :  { %262 = vmatprep.subr.bf16.mxu0 %v1774_v9  ;;  %303 = vmatprep.subr.bf16.mxu1 %v1794_v16  ;;  %v63_v45 = vld [vmem:[#allocation2 + $0x18] sm:$0xff]  ;;  %s1278_s10 = sshll.u32 %s1715_s9, 4  ;;  %s1279_s10 = int_to_ptr.vmem [resolvable:$true] %s1278_s10 }
  0x36   :  { %s1677_s11 = scalar_lea.vmem %s1279_s10, 128  ;;  %p1682_p2 = scmp.lt.s32.totalorder %s1279_s10, %s1279_s10 }
  0x37   :  { %p1678_p1 = scmp.ne.s32.totalorder %s1279_s10, %s1677_s11  ;;  %p1683_p3 = scmp.lt.s32.totalorder %s1677_s11, %s1677_s11 }
  0x38   :  { %263 = vmatpush1.bf16.msra.mxu0 %v1783_v12  ;;  %304 = vmatpush1.bf16.msra.mxu1 %v1803_v19 }
  0x39   :  { %264 = vmatprep.subr.bf16.mxu0 %v1785_v13  ;;  %305 = vmatprep.subr.bf16.mxu1 %v1806_v20  ;;  %p1684_p4 = por %p1683_p3, %p1682_p2 }
  0x3b   :  { %p1685_p5 = pnand %p1684_p4, %p1678_p1 }
  0x3c   :  { %265 = vmatpush1.bf16.msra.mxu0 %v1797_v17  ;;  %306 = vmatpush1.bf16.msra.mxu1 %v1815_v23 }
  0x3d   :  { %266 = vmatprep.subr.bf16.mxu0 %v1800_v18  ;;  %307 = vmatprep.subr.bf16.mxu1 %v1818_v24 }
  0x40   :  { %267 = vmatpush1.bf16.msra.mxu0 %v1809_v21  ;;  %308 = vmatpush1.bf16.msra.mxu1 %v1827_v27 }
  0x41   :  { %268 = vmatprep.subr.bf16.mxu0 %v1811_v22  ;;  %309 = vmatprep.subr.bf16.mxu1 %v1830_v28 }
  0x44   :  { %269 = vmatpush1.bf16.msra.mxu0 %v1821_v25  ;;  %310 = vmatpush1.bf16.msra.mxu1 %v1837_v30 }
  0x45   :  { %270 = vmatprep.subr.bf16.mxu0 %v1824_v26  ;;  %311 = vmatprep.subr.bf16.mxu1 %v1840_v31 }
  0x48   :  { %271 = vmatpush1.bf16.msra.mxu0 %v1833_v29  ;;  %312 = vmatpush1.bf16.msra.mxu1 %v1844_v32 }
  0x49   :  { %372 = vmatprep.subr.bf16.mxu0 %v1752_v1  ;;  %413 = vmatprep.subr.bf16.mxu1 %v1765_v6 }
  0x4b   :  { %289 = vmatmul.mubr.bf16.vlgmr.msra.gmra.mxu0 %v1712_v0  ;;  %330 = vmatmul.mubr.bf16.vlgmr.msra.gmra.mxu1 %v1712_v0 }
  0x4c   :  { %373 = vmatpush1.bf16.msra.mxu0 %v1754_v2  ;;  %404 = vmatprep.mubr.bf16.mxu0 %v1712_v0 }
  0x4d   :  { %374 = vmatprep.subr.bf16.mxu0 %v1757_v3  ;;  %414 = vmatpush1.bf16.msra.mxu1 %v1767_v7 }
  0x4e   :  { %415 = vmatprep.subr.bf16.mxu1 %v1777_v10  ;;  %445 = vmatprep.mubr.bf16.mxu1 %v1712_v0 }
  0x50   :  { %375 = vmatpush1.bf16.msra.mxu0 %v1760_v4 }
  0x51   :  { %376 = vmatprep.subr.bf16.mxu0 %v1763_v5  ;;  %416 = vmatpush1.bf16.msra.mxu1 %v1779_v11 }
  0x52   :  { %417 = vmatprep.subr.bf16.mxu1 %v1787_v14 }
  0x54   :  { %377 = vmatpush1.bf16.msra.mxu0 %v1770_v8 }
  0x55   :  { %378 = vmatprep.subr.bf16.mxu0 %v1774_v9  ;;  %418 = vmatpush1.bf16.msra.mxu1 %v1791_v15 }
  0x56   :  { %419 = vmatprep.subr.bf16.mxu1 %v1794_v16 }
  0x58   :  { %379 = vmatpush1.bf16.msra.mxu0 %v1783_v12 }
  0x59   :  { %380 = vmatprep.subr.bf16.mxu0 %v1785_v13  ;;  %420 = vmatpush1.bf16.msra.mxu1 %v1803_v19 }
  0x5a   :  { %421 = vmatprep.subr.bf16.mxu1 %v1806_v20 }
  0x5c   :  { %381 = vmatpush1.bf16.msra.mxu0 %v1797_v17 }
  0x5d   :  { %382 = vmatprep.subr.bf16.mxu0 %v1800_v18  ;;  %422 = vmatpush1.bf16.msra.mxu1 %v1815_v23 }
  0x5e   :  { %423 = vmatprep.subr.bf16.mxu1 %v1818_v24 }
  0x60   :  { %383 = vmatpush1.bf16.msra.mxu0 %v1809_v21 }
  0x61   :  { %384 = vmatprep.subr.bf16.mxu0 %v1811_v22  ;;  %424 = vmatpush1.bf16.msra.mxu1 %v1827_v27 }
  0x62   :  { %425 = vmatprep.subr.bf16.mxu1 %v1830_v28 }
  0x64   :  { %385 = vmatpush1.bf16.msra.mxu0 %v1821_v25 }
  0x65   :  { %386 = vmatprep.subr.bf16.mxu0 %v1824_v26  ;;  %426 = vmatpush1.bf16.msra.mxu1 %v1837_v30 }
  0x66   :  { %427 = vmatprep.subr.bf16.mxu1 %v1840_v31 }
  0x68   :  { %387 = vmatpush1.bf16.msra.mxu0 %v1833_v29 }
  0x69   :  { %488 = vmatprep.subr.bf16.mxu0 %v1752_v1  ;;  %428 = vmatpush1.bf16.msra.mxu1 %v1844_v32 }
  0x6a   :  { %529 = vmatprep.subr.bf16.mxu1 %v1765_v6 }
 0x10b   :  { %v290_v34 = vpop.f32.mrf.mxu0  ;;  %v331_v42 = vpop.f32.mrf.mxu1 }
 0x10c   :  { %v338_v36 = vadd.f32 %v290_v34, %v60_v33  ;;  %v340_v50 = vadd.f32 %v331_v42, %v62_v48 }
 0x10d   :  { %v292_v37 = vpop.f32.mrf.mxu0  ;;  %v333_v44 = vpop.f32.mrf.mxu1 }
 0x10e   :  { %v1320_v38 = vmul.f32 -1.442695, %v338_v36  ;;  %v339_v39 = vadd.f32 %v292_v37, %v61_v35  ;;  %v341_v49 = vadd.f32 %v333_v44, %v63_v45  ;;  %v367_v37 = vld [vmem:[#allocation2 + $0x20] sm:$0xff] }
 0x10f   :  { %v294_v40 = vpop.f32.mrf.mxu0  ;;  %v335_v46 = vpop.f32.mrf.mxu1 }
 0x110   :  { %1458 = vpow2.f32 %v1320_v38  ;;  %v1321_v41 = vmul.f32 -1.442695, %v339_v39  ;;  %v1322_v51 = vmul.f32 -1.442695, %v341_v49  ;;  %v368_v40 = vld [vmem:[#allocation2 + $0x28] sm:$0xff] }
 0x111   :  { %v295_v43 = vpop.f32.mrf.mxu0  ;;  %v336_v47 = vpop.f32.mrf.mxu1 }
 0x112   :  { %1460 = vpow2.f32 %v1321_v41 }
 0x113   :  { %1462 = vtanh.f32 %v340_v50 }
 0x114   :  { %1464 = vpow2.f32 %v1322_v51  ;;  %v370_v51 = vld [vmem:[#allocation2 + $0x38] sm:$0xff] }
 0x11d   :  { %v1459_v52 = vpop.eup %1458 }
 0x11e   :  { %v348_v53 = vadd.f32 1.0, %v1459_v52 }
 0x11f   :  { %v1461_v54 = vpop.eup %1460 }
 0x120   :  { %1466 = vrcp.f32 %v348_v53  ;;  %v349_v55 = vadd.f32 1.0, %v1461_v54  ;;  %v1463_v56 = vpop.eup %1462  ;;  %v369_v53 = vld [vmem:[#allocation2 + $0x30] sm:$0xff] }
 0x121   :  { %v1465_v57 = vpop.eup %1464 }
 0x122   :  { %1468 = vrcp.f32 %v349_v55  ;;  %v358_v60 = vadd.f32 1.0, %v1465_v57 }
 0x124   :  { %1470 = vrcp.f32 %v358_v60 }
 0x12d   :  { %v1467_v58 = vpop.eup %1466 }
 0x12e   :  { %v362_v62 = vmul.f32 %v1467_v58, %v1463_v56 }
 0x12f   :  { %v1469_v59 = vpop.eup %1468 }
 0x130   :  { %v361_v61 = vmul.f32 0.0, %v1469_v59 }
 0x131   :  { %v1471_v33 = vpop.eup %1470 }
 0x132   :  { %v1886_v63 = vadd.f32 %v362_v62, %v361_v61 }
 0x134   :  { %1472 = vtanh.f32 %v1886_v63 }
 0x141   :  { %v1473_v34 = vpop.eup %1472 }
 0x142   :  { %v365_v35 = vmul.f32 %v1473_v34, %v1471_v33 }
 0x144   :  { %v371_v36 = vpack.c.bf16 %v365_v35, %v365_v35 }
 0x146   :  { %405 = vmatmul.mubr.bf16.vlgmr.msra.gmra.mxu0 %v371_v36  ;;  %446 = vmatmul.mubr.bf16.vlgmr.msra.gmra.mxu1 %v371_v36 }
 0x147   :  { %489 = vmatpush1.bf16.msra.mxu0 %v1754_v2  ;;  %530 = vmatpush1.bf16.msra.mxu1 %v1767_v7 }
 0x148   :  { %490 = vmatprep.subr.bf16.mxu0 %v1757_v3  ;;  %531 = vmatprep.subr.bf16.mxu1 %v1777_v10 }
 0x149   :  { %520 = vmatprep.mubr.bf16.mxu0 %v1712_v0  ;;  %561 = vmatprep.mubr.bf16.mxu1 %v1712_v0 }
 0x14b   :  { %491 = vmatpush1.bf16.msra.mxu0 %v1760_v4  ;;  %532 = vmatpush1.bf16.msra.mxu1 %v1779_v11 }
 0x14c   :  { %492 = vmatprep.subr.bf16.mxu0 %v1763_v5  ;;  %533 = vmatprep.subr.bf16.mxu1 %v1787_v14 }
 0x14f   :  { %493 = vmatpush1.bf16.msra.mxu0 %v1770_v8  ;;  %534 = vmatpush1.bf16.msra.mxu1 %v1791_v15 }
 0x150   :  { %494 = vmatprep.subr.bf16.mxu0 %v1774_v9  ;;  %535 = vmatprep.subr.bf16.mxu1 %v1794_v16 }
 0x153   :  { %495 = vmatpush1.bf16.msra.mxu0 %v1783_v12  ;;  %536 = vmatpush1.bf16.msra.mxu1 %v1803_v19 }
 0x154   :  { %496 = vmatprep.subr.bf16.mxu0 %v1785_v13  ;;  %537 = vmatprep.subr.bf16.mxu1 %v1806_v20 }
 0x157   :  { %497 = vmatpush1.bf16.msra.mxu0 %v1797_v17  ;;  %538 = vmatpush1.bf16.msra.mxu1 %v1815_v23 }
 0x158   :  { %498 = vmatprep.subr.bf16.mxu0 %v1800_v18  ;;  %539 = vmatprep.subr.bf16.mxu1 %v1818_v24 }
 0x15b   :  { %499 = vmatpush1.bf16.msra.mxu0 %v1809_v21  ;;  %540 = vmatpush1.bf16.msra.mxu1 %v1827_v27 }
 0x15c   :  { %500 = vmatprep.subr.bf16.mxu0 %v1811_v22  ;;  %541 = vmatprep.subr.bf16.mxu1 %v1830_v28 }
 0x15f   :  { %501 = vmatpush1.bf16.msra.mxu0 %v1821_v25  ;;  %542 = vmatpush1.bf16.msra.mxu1 %v1837_v30 }
 0x160   :  { %502 = vmatprep.subr.bf16.mxu0 %v1824_v26  ;;  %543 = vmatprep.subr.bf16.mxu1 %v1840_v31 }
 0x163   :  { %503 = vmatpush1.bf16.msra.mxu0 %v1833_v29  ;;  %544 = vmatpush1.bf16.msra.mxu1 %v1844_v32 }
 0x164   :  { %604 = vmatprep.subr.bf16.mxu0 %v1752_v1  ;;  %645 = vmatprep.subr.bf16.mxu1 %v1765_v6 }
 0x206   :  { %v406_v38 = vpop.f32.mrf.mxu0  ;;  %v447_v39 = vpop.f32.mrf.mxu1 }
 0x207   :  { %v454_v41 = vadd.f32 %v406_v38, %v367_v37  ;;  %v456_v56 = vadd.f32 %v447_v39, %v369_v53 }
 0x208   :  { %v408_v42 = vpop.f32.mrf.mxu0  ;;  %v449_v43 = vpop.f32.mrf.mxu1 }
 0x209   :  { %v1323_v44 = vmul.f32 -1.442695, %v454_v41  ;;  %v455_v45 = vadd.f32 %v408_v42, %v368_v40  ;;  %v457_v52 = vadd.f32 %v449_v43, %v370_v51 }
 0x20a   :  { %v410_v46 = vpop.f32.mrf.mxu0  ;;  %v451_v47 = vpop.f32.mrf.mxu1 }
 0x20b   :  { %1474 = vpow2.f32 %v1323_v44  ;;  %v1324_v48 = vmul.f32 -1.442695, %v455_v45  ;;  %v1325_v54 = vmul.f32 -1.442695, %v457_v52  ;;  %v484_v44 = vld [vmem:[#allocation2 + $0x48] sm:$0xff] }
 0x20c   :  { %v411_v49 = vpop.f32.mrf.mxu0  ;;  %v452_v50 = vpop.f32.mrf.mxu1 }
 0x20d   :  { %1476 = vpow2.f32 %v1324_v48 }
 0x20e   :  { %1478 = vpow2.f32 %v1325_v54 }
 0x218   :  { %v1475_v55 = vpop.eup %1474 }
 0x219   :  { %v464_v57 = vadd.f32 1.0, %v1475_v55  ;;  %v486_v55 = vld [vmem:[#allocation2 + $0x58] sm:$0xff] }
 0x21a   :  { %v1477_v58 = vpop.eup %1476 }
 0x21b   :  { %1480 = vrcp.f32 %v464_v57  ;;  %v465_v59 = vadd.f32 1.0, %v1477_v58  ;;  %v1479_v60 = vpop.eup %1478  ;;  %v485_v57 = vld [vmem:[#allocation2 + $0x50] sm:$0xff] }
 0x21c   :  { %1482 = vtanh.f32 %v456_v56  ;;  %v474_v34 = vadd.f32 1.0, %v1479_v60 }
 0x21d   :  { %1484 = vrcp.f32 %v465_v59 }
 0x21e   :  { %1486 = vrcp.f32 %v474_v34 }
 0x228   :  { %v1481_v61 = vpop.eup %1480 }
 0x229   :  { %v1483_v62 = vpop.eup %1482 }
 0x22a   :  { %v1485_v33 = vpop.eup %1484  ;;  %v478_v35 = vmul.f32 %v1483_v62, %v1481_v61 }
 0x22b   :  { %v477_v36 = vmul.f32 %v1485_v33, %v1886_v63  ;;  %v1487_v38 = vpop.eup %1486  ;;  %v483_v63 = vld [vmem:[#allocation2 + $0x40] sm:$0xff] }
 0x22d   :  { %v1924_v37 = vadd.f32 %v478_v35, %v477_v36 }
 0x22f   :  { %1488 = vtanh.f32 %v1924_v37 }
 0x23c   :  { %v1489_v39 = vpop.eup %1488 }
 0x23d   :  { %v481_v40 = vmul.f32 %v1489_v39, %v1487_v38 }
 0x23f   :  { %v487_v41 = vpack.c.bf16 %v481_v40, %v481_v40 }
 0x241   :  { %521 = vmatmul.mubr.bf16.vlgmr.msra.gmra.mxu0 %v487_v41  ;;  %562 = vmatmul.mubr.bf16.vlgmr.msra.gmra.mxu1 %v487_v41 }
 0x242   :  { %605 = vmatpush1.bf16.msra.mxu0 %v1754_v2  ;;  %646 = vmatpush1.bf16.msra.mxu1 %v1767_v7 }
 0x243   :  { %606 = vmatprep.subr.bf16.mxu0 %v1757_v3  ;;  %647 = vmatprep.subr.bf16.mxu1 %v1777_v10 }
 0x244   :  { %636 = vmatprep.mubr.bf16.mxu0 %v1712_v0  ;;  %677 = vmatprep.mubr.bf16.mxu1 %v1712_v0 }
 0x246   :  { %607 = vmatpush1.bf16.msra.mxu0 %v1760_v4  ;;  %648 = vmatpush1.bf16.msra.mxu1 %v1779_v11 }
 0x247   :  { %608 = vmatprep.subr.bf16.mxu0 %v1763_v5  ;;  %649 = vmatprep.subr.bf16.mxu1 %v1787_v14 }
 0x24a   :  { %609 = vmatpush1.bf16.msra.mxu0 %v1770_v8  ;;  %650 = vmatpush1.bf16.msra.mxu1 %v1791_v15 }
 0x24b   :  { %610 = vmatprep.subr.bf16.mxu0 %v1774_v9  ;;  %651 = vmatprep.subr.bf16.mxu1 %v1794_v16 }
 0x24e   :  { %611 = vmatpush1.bf16.msra.mxu0 %v1783_v12  ;;  %652 = vmatpush1.bf16.msra.mxu1 %v1803_v19 }
 0x24f   :  { %612 = vmatprep.subr.bf16.mxu0 %v1785_v13  ;;  %653 = vmatprep.subr.bf16.mxu1 %v1806_v20 }
 0x252   :  { %613 = vmatpush1.bf16.msra.mxu0 %v1797_v17  ;;  %654 = vmatpush1.bf16.msra.mxu1 %v1815_v23 }
 0x253   :  { %614 = vmatprep.subr.bf16.mxu0 %v1800_v18  ;;  %655 = vmatprep.subr.bf16.mxu1 %v1818_v24 }
 0x256   :  { %615 = vmatpush1.bf16.msra.mxu0 %v1809_v21  ;;  %656 = vmatpush1.bf16.msra.mxu1 %v1827_v27 }
 0x257   :  { %616 = vmatprep.subr.bf16.mxu0 %v1811_v22  ;;  %657 = vmatprep.subr.bf16.mxu1 %v1830_v28 }
 0x25a   :  { %617 = vmatpush1.bf16.msra.mxu0 %v1821_v25  ;;  %658 = vmatpush1.bf16.msra.mxu1 %v1837_v30 }
 0x25b   :  { %618 = vmatprep.subr.bf16.mxu0 %v1824_v26  ;;  %659 = vmatprep.subr.bf16.mxu1 %v1840_v31 }
 0x25e   :  { %619 = vmatpush1.bf16.msra.mxu0 %v1833_v29  ;;  %660 = vmatpush1.bf16.msra.mxu1 %v1844_v32 }
 0x25f   :  { %720 = vmatprep.subr.bf16.mxu0 %v1752_v1  ;;  %761 = vmatprep.subr.bf16.mxu1 %v1765_v6 }
 0x301   :  { %v522_v42 = vpop.f32.mrf.mxu0  ;;  %v563_v43 = vpop.f32.mrf.mxu1 }
 0x302   :  { %v570_v45 = vadd.f32 %v522_v42, %v483_v63  ;;  %v572_v60 = vadd.f32 %v563_v43, %v485_v57 }
 0x303   :  { %v524_v46 = vpop.f32.mrf.mxu0  ;;  %v565_v47 = vpop.f32.mrf.mxu1 }
 0x304   :  { %v1326_v48 = vmul.f32 -1.442695, %v570_v45  ;;  %v571_v49 = vadd.f32 %v524_v46, %v484_v44  ;;  %v573_v56 = vadd.f32 %v565_v47, %v486_v55 }
 0x305   :  { %v526_v50 = vpop.f32.mrf.mxu0  ;;  %v567_v51 = vpop.f32.mrf.mxu1 }
 0x306   :  { %1490 = vpow2.f32 %v1326_v48  ;;  %v1327_v52 = vmul.f32 -1.442695, %v571_v49  ;;  %v1328_v58 = vmul.f32 -1.442695, %v573_v56  ;;  %v600_v48 = vld [vmem:[#allocation2 + $0x68] sm:$0xff] }
 0x307   :  { %v527_v53 = vpop.f32.mrf.mxu0  ;;  %v568_v54 = vpop.f32.mrf.mxu1 }
 0x308   :  { %1492 = vpow2.f32 %v1327_v52 }
 0x309   :  { %1494 = vpow2.f32 %v1328_v58 }
 0x313   :  { %v1491_v59 = vpop.eup %1490 }
 0x314   :  { %v580_v61 = vadd.f32 1.0, %v1491_v59  ;;  %v602_v59 = vld [vmem:[#allocation2 + $0x78] sm:$0xff] }
 0x315   :  { %v1493_v62 = vpop.eup %1492 }
 0x316   :  { %1496 = vrcp.f32 %v580_v61  ;;  %v581_v33 = vadd.f32 1.0, %v1493_v62  ;;  %v1495_v34 = vpop.eup %1494  ;;  %v601_v61 = vld [vmem:[#allocation2 + $0x70] sm:$0xff] }
 0x317   :  { %1498 = vtanh.f32 %v572_v60  ;;  %v590_v39 = vadd.f32 1.0, %v1495_v34 }
 0x318   :  { %1500 = vrcp.f32 %v581_v33 }
 0x319   :  { %1502 = vrcp.f32 %v590_v39 }
 0x323   :  { %v1497_v35 = vpop.eup %1496 }
 0x324   :  { %v1499_v36 = vpop.eup %1498 }
 0x325   :  { %v1501_v38 = vpop.eup %1500  ;;  %v594_v40 = vmul.f32 %v1499_v36, %v1497_v35 }
 0x326   :  { %v593_v41 = vmul.f32 %v1501_v38, %v1924_v37  ;;  %v1503_v42 = vpop.eup %1502  ;;  %v599_v37 = vld [vmem:[#allocation2 + $0x60] sm:$0xff] }
 0x328   :  { %v1962_v63 = vadd.f32 %v594_v40, %v593_v41 }
 0x32a   :  { %1504 = vtanh.f32 %v1962_v63 }
 0x337   :  { %v1505_v43 = vpop.eup %1504 }
 0x338   :  { %v597_v44 = vmul.f32 %v1505_v43, %v1503_v42 }
 0x33a   :  { %v603_v45 = vpack.c.bf16 %v597_v44, %v597_v44 }
 0x33c   :  { %637 = vmatmul.mubr.bf16.vlgmr.msra.gmra.mxu0 %v603_v45  ;;  %678 = vmatmul.mubr.bf16.vlgmr.msra.gmra.mxu1 %v603_v45 }
 0x33d   :  { %721 = vmatpush1.bf16.msra.mxu0 %v1754_v2  ;;  %762 = vmatpush1.bf16.msra.mxu1 %v1767_v7 }
 0x33e   :  { %722 = vmatprep.subr.bf16.mxu0 %v1757_v3  ;;  %763 = vmatprep.subr.bf16.mxu1 %v1777_v10 }
 0x33f   :  { %752 = vmatprep.mubr.bf16.mxu0 %v1712_v0  ;;  %793 = vmatprep.mubr.bf16.mxu1 %v1712_v0 }
 0x341   :  { %723 = vmatpush1.bf16.msra.mxu0 %v1760_v4  ;;  %764 = vmatpush1.bf16.msra.mxu1 %v1779_v11 }
 0x342   :  { %724 = vmatprep.subr.bf16.mxu0 %v1763_v5  ;;  %765 = vmatprep.subr.bf16.mxu1 %v1787_v14 }
 0x345   :  { %725 = vmatpush1.bf16.msra.mxu0 %v1770_v8  ;;  %766 = vmatpush1.bf16.msra.mxu1 %v1791_v15 }
 0x346   :  { %726 = vmatprep.subr.bf16.mxu0 %v1774_v9  ;;  %767 = vmatprep.subr.bf16.mxu1 %v1794_v16 }
 0x349   :  { %727 = vmatpush1.bf16.msra.mxu0 %v1783_v12  ;;  %768 = vmatpush1.bf16.msra.mxu1 %v1803_v19 }
 0x34a   :  { %728 = vmatprep.subr.bf16.mxu0 %v1785_v13  ;;  %769 = vmatprep.subr.bf16.mxu1 %v1806_v20 }
 0x34d   :  { %729 = vmatpush1.bf16.msra.mxu0 %v1797_v17  ;;  %770 = vmatpush1.bf16.msra.mxu1 %v1815_v23 }
 0x34e   :  { %730 = vmatprep.subr.bf16.mxu0 %v1800_v18  ;;  %771 = vmatprep.subr.bf16.mxu1 %v1818_v24 }
 0x351   :  { %731 = vmatpush1.bf16.msra.mxu0 %v1809_v21  ;;  %772 = vmatpush1.bf16.msra.mxu1 %v1827_v27 }
 0x352   :  { %732 = vmatprep.subr.bf16.mxu0 %v1811_v22  ;;  %773 = vmatprep.subr.bf16.mxu1 %v1830_v28 }
 0x355   :  { %733 = vmatpush1.bf16.msra.mxu0 %v1821_v25  ;;  %774 = vmatpush1.bf16.msra.mxu1 %v1837_v30 }
 0x356   :  { %734 = vmatprep.subr.bf16.mxu0 %v1824_v26  ;;  %775 = vmatprep.subr.bf16.mxu1 %v1840_v31 }
 0x359   :  { %735 = vmatpush1.bf16.msra.mxu0 %v1833_v29  ;;  %776 = vmatpush1.bf16.msra.mxu1 %v1844_v32 }
 0x35a   :  { %836 = vmatprep.subr.bf16.mxu0 %v1752_v1  ;;  %877 = vmatprep.subr.bf16.mxu1 %v1765_v6 }
 0x3fc   :  { %v638_v46 = vpop.f32.mrf.mxu0  ;;  %v679_v47 = vpop.f32.mrf.mxu1 }
 0x3fd   :  { %v686_v49 = vadd.f32 %v638_v46, %v599_v37  ;;  %v688_v34 = vadd.f32 %v679_v47, %v601_v61 }
 0x3fe   :  { %v640_v50 = vpop.f32.mrf.mxu0  ;;  %v681_v51 = vpop.f32.mrf.mxu1 }
 0x3ff   :  { %v1329_v52 = vmul.f32 -1.442695, %v686_v49  ;;  %v687_v53 = vadd.f32 %v640_v50, %v600_v48  ;;  %v689_v60 = vadd.f32 %v681_v51, %v602_v59 }
 0x400   :  { %v642_v54 = vpop.f32.mrf.mxu0  ;;  %v683_v55 = vpop.f32.mrf.mxu1 }
 0x401   :  { %1506 = vpow2.f32 %v1329_v52  ;;  %v1330_v56 = vmul.f32 -1.442695, %v687_v53  ;;  %v1331_v62 = vmul.f32 -1.442695, %v689_v60  ;;  %v716_v52 = vld [vmem:[#allocation2 + $0x88] sm:$0xff] }
 0x402   :  { %v643_v57 = vpop.f32.mrf.mxu0  ;;  %v684_v58 = vpop.f32.mrf.mxu1 }
 0x403   :  { %1508 = vpow2.f32 %v1330_v56 }
 0x404   :  { %1510 = vpow2.f32 %v1331_v62 }
 0x40e   :  { %v1507_v33 = vpop.eup %1506 }
 0x40f   :  { %v696_v35 = vadd.f32 1.0, %v1507_v33  ;;  %v718_v33 = vld [vmem:[#allocation2 + $0x98] sm:$0xff] }
 0x410   :  { %v1509_v36 = vpop.eup %1508 }
 0x411   :  { %1512 = vrcp.f32 %v696_v35  ;;  %v697_v38 = vadd.f32 1.0, %v1509_v36  ;;  %v1511_v39 = vpop.eup %1510 }
 0x412   :  { %1514 = vtanh.f32 %v688_v34  ;;  %v706_v43 = vadd.f32 1.0, %v1511_v39  ;;  %v717_v34 = vld [vmem:[#allocation2 + $0x90] sm:$0xff] }
 0x413   :  { %1516 = vrcp.f32 %v697_v38 }
 0x414   :  { %1518 = vrcp.f32 %v706_v43 }
 0x41e   :  { %v1513_v40 = vpop.eup %1512 }
 0x41f   :  { %v1515_v41 = vpop.eup %1514 }
 0x420   :  { %v1517_v42 = vpop.eup %1516  ;;  %v710_v44 = vmul.f32 %v1515_v41, %v1513_v40 }
 0x421   :  { %v709_v45 = vmul.f32 %v1517_v42, %v1962_v63  ;;  %v1519_v46 = vpop.eup %1518  ;;  %v715_v63 = vld [vmem:[#allocation2 + $0x80] sm:$0xff] }
 0x423   :  { %v2000_v37 = vadd.f32 %v710_v44, %v709_v45 }
 0x425   :  { %1520 = vtanh.f32 %v2000_v37 }
 0x432   :  { %v1521_v47 = vpop.eup %1520 }
 0x433   :  { %v713_v48 = vmul.f32 %v1521_v47, %v1519_v46 }
 0x435   :  { %v719_v49 = vpack.c.bf16 %v713_v48, %v713_v48 }
 0x437   :  { %753 = vmatmul.mubr.bf16.vlgmr.msra.gmra.mxu0 %v719_v49  ;;  %794 = vmatmul.mubr.bf16.vlgmr.msra.gmra.mxu1 %v719_v49 }
 0x438   :  { %837 = vmatpush1.bf16.msra.mxu0 %v1754_v2  ;;  %878 = vmatpush1.bf16.msra.mxu1 %v1767_v7 }
 0x439   :  { %838 = vmatprep.subr.bf16.mxu0 %v1757_v3  ;;  %879 = vmatprep.subr.bf16.mxu1 %v1777_v10 }
 0x43a   :  { %868 = vmatprep.mubr.bf16.mxu0 %v1712_v0  ;;  %909 = vmatprep.mubr.bf16.mxu1 %v1712_v0 }
 0x43c   :  { %839 = vmatpush1.bf16.msra.mxu0 %v1760_v4  ;;  %880 = vmatpush1.bf16.msra.mxu1 %v1779_v11 }
 0x43d   :  { %840 = vmatprep.subr.bf16.mxu0 %v1763_v5  ;;  %881 = vmatprep.subr.bf16.mxu1 %v1787_v14 }
 0x440   :  { %841 = vmatpush1.bf16.msra.mxu0 %v1770_v8  ;;  %882 = vmatpush1.bf16.msra.mxu1 %v1791_v15 }
 0x441   :  { %842 = vmatprep.subr.bf16.mxu0 %v1774_v9  ;;  %883 = vmatprep.subr.bf16.mxu1 %v1794_v16 }
 0x444   :  { %843 = vmatpush1.bf16.msra.mxu0 %v1783_v12  ;;  %884 = vmatpush1.bf16.msra.mxu1 %v1803_v19 }
 0x445   :  { %844 = vmatprep.subr.bf16.mxu0 %v1785_v13  ;;  %885 = vmatprep.subr.bf16.mxu1 %v1806_v20 }
 0x448   :  { %845 = vmatpush1.bf16.msra.mxu0 %v1797_v17  ;;  %886 = vmatpush1.bf16.msra.mxu1 %v1815_v23 }
 0x449   :  { %846 = vmatprep.subr.bf16.mxu0 %v1800_v18  ;;  %887 = vmatprep.subr.bf16.mxu1 %v1818_v24 }
 0x44c   :  { %847 = vmatpush1.bf16.msra.mxu0 %v1809_v21  ;;  %888 = vmatpush1.bf16.msra.mxu1 %v1827_v27 }
 0x44d   :  { %848 = vmatprep.subr.bf16.mxu0 %v1811_v22  ;;  %889 = vmatprep.subr.bf16.mxu1 %v1830_v28 }
 0x450   :  { %849 = vmatpush1.bf16.msra.mxu0 %v1821_v25  ;;  %890 = vmatpush1.bf16.msra.mxu1 %v1837_v30 }
 0x451   :  { %850 = vmatprep.subr.bf16.mxu0 %v1824_v26  ;;  %891 = vmatprep.subr.bf16.mxu1 %v1840_v31 }
 0x454   :  { %851 = vmatpush1.bf16.msra.mxu0 %v1833_v29  ;;  %892 = vmatpush1.bf16.msra.mxu1 %v1844_v32 }
 0x455   :  { %952 = vmatprep.subr.bf16.mxu0 %v1752_v1  ;;  %993 = vmatprep.subr.bf16.mxu1 %v1765_v6 }
 0x4f7   :  { %v754_v50 = vpop.f32.mrf.mxu0  ;;  %v795_v51 = vpop.f32.mrf.mxu1 }
 0x4f8   :  { %v802_v53 = vadd.f32 %v754_v50, %v715_v63  ;;  %v804_v38 = vadd.f32 %v795_v51, %v717_v34  ;;  %v1595_v34 = vld [vmem:[#allocation5 + $0xa0] ss:$16 sps:$4 sm:$0xff]  }
 0x4f9   :  { %v756_v54 = vpop.f32.mrf.mxu0  ;;  %v797_v55 = vpop.f32.mrf.mxu1 }
 0x4fa   :  { %v1332_v56 = vmul.f32 -1.442695, %v802_v53  ;;  %v803_v57 = vadd.f32 %v756_v54, %v716_v52  ;;  %v805_v1 = vadd.f32 %v797_v55, %v718_v33  ;;  %v1593_v33 = vld [vmem:[#allocation5 + $0xa4] ss:$16 sps:$4 sm:$0xff]  }
 0x4fb   :  { %v758_v58 = vpop.f32.mrf.mxu0  ;;  %v799_v59 = vpop.f32.mrf.mxu1 }
 0x4fc   :  { %1522 = vpow2.f32 %v1332_v56  ;;  %v1333_v60 = vmul.f32 -1.442695, %v803_v57  ;;  %v1334_v35 = vmul.f32 -1.442695, %v805_v1  ;;  %v1587_v57 = vld [vmem:[#allocation5 + $0xe0] ss:$16 sps:$4 sm:$0xff]  }
 0x4fd   :  { %v759_v61 = vpop.f32.mrf.mxu0  ;;  %v800_v62 = vpop.f32.mrf.mxu1  ;;  %v1588_v58 = vld [vmem:[#allocation5 + $0xe8] ss:$16 sps:$4 sm:$0xff]   ;;  %v1589_v59 = vld [vmem:[#allocation5 + $0xc4] ss:$16 sps:$4 sm:$0xff]   ;;  %v1594_v1 = vld [vmem:[#allocation5 + $0xac] ss:$16 sps:$4 sm:$0xff]  }
 0x4fe   :  { %1524 = vpow2.f32 %v1333_v60  ;;  %v1590_v60 = vld [vmem:[#allocation5 + $0xcc] ss:$16 sps:$4 sm:$0xff]   ;;  %v1591_v61 = vld [vmem:[#allocation5 + $0xc0] ss:$16 sps:$4 sm:$0xff]   ;;  %v1592_v62 = vld [vmem:[#allocation5 + $0xc8] ss:$16 sps:$4 sm:$0xff]  }
 0x4ff   :  { %1526 = vpow2.f32 %v1334_v35  ;;  %v1596_v35 = vld [vmem:[#allocation5 + $0xa8] ss:$16 sps:$4 sm:$0xff]  }
 0x509   :  { %v1523_v36 = vpop.eup %1522 }
 0x50a   :  { %v812_v39 = vadd.f32 1.0, %v1523_v36  ;;  %v1597_v36 = vld [vmem:[#allocation5 + $0x84] ss:$16 sps:$4 sm:$0xff]  }
 0x50b   :  { %v1525_v40 = vpop.eup %1524 }
 0x50c   :  { %1528 = vrcp.f32 %v812_v39  ;;  %v813_v41 = vadd.f32 1.0, %v1525_v40  ;;  %v1527_v42 = vpop.eup %1526  ;;  %v1599_v39 = vld [vmem:[#allocation5 + $0x80] ss:$16 sps:$4 sm:$0xff]   ;;  %v1600_v40 = vld [vmem:[#allocation5 + $0x88] ss:$16 sps:$4 sm:$0xff]  }
 0x50d   :  { %1530 = vtanh.f32 %v804_v38  ;;  %v822_v46 = vadd.f32 1.0, %v1527_v42  ;;  %v1598_v38 = vld [vmem:[#allocation5 + $0x8c] ss:$16 sps:$4 sm:$0xff]   ;;  %v1603_v42 = vld [vmem:[#allocation5 + $0x60] ss:$16 sps:$4 sm:$0xff]  }
 0x50e   :  { %1532 = vrcp.f32 %v813_v41  ;;  %v1602_v41 = vld [vmem:[#allocation5 + $0x6c] ss:$16 sps:$4 sm:$0xff]  }
 0x50f   :  { %1534 = vrcp.f32 %v822_v46  ;;  %v1607_v46 = vld [vmem:[#allocation5 + $0x40] ss:$16 sps:$4 sm:$0xff]  }
 0x519   :  { %v1529_v43 = vpop.eup %1528 }
 0x51a   :  { %v1531_v44 = vpop.eup %1530 }
 0x51b   :  { %v1533_v45 = vpop.eup %1532  ;;  %v826_v47 = vmul.f32 %v1531_v44, %v1529_v43  ;;  %v1604_v43 = vld [vmem:[#allocation5 + $0x68] ss:$16 sps:$4 sm:$0xff]   ;;  %v1605_v44 = vld [vmem:[#allocation5 + $0x44] ss:$16 sps:$4 sm:$0xff]  }
 0x51c   :  { %v825_v48 = vmul.f32 %v1533_v45, %v2000_v37  ;;  %v1535_v63 = vpop.eup %1534  ;;  %v1606_v45 = vld [vmem:[#allocation5 + $0x4c] ss:$16 sps:$4 sm:$0xff]  }
 0x51e   :  { %v2038_v49 = vadd.f32 %v826_v47, %v825_v48  ;;  %v1608_v47 = vld [vmem:[#allocation5 + $0x48] ss:$16 sps:$4 sm:$0xff]   ;;  %v1609_v48 = vld [vmem:[#allocation5 + $0x24] ss:$16 sps:$4 sm:$0xff]  }
 0x520   :  { %1536 = vtanh.f32 %v2038_v49 }
 0x52d   :  { %v1537_v50 = vpop.eup %1536 }
 0x52e   :  { %v829_v51 = vmul.f32 %v1537_v50, %v1535_v63  ;;  %v1611_v63 = vld [vmem:[#allocation5 + $0x20] ss:$16 sps:$4 sm:$0xff]   ;;  %v1612_v50 = vld [vmem:[#allocation5 + $0x28] ss:$16 sps:$4 sm:$0xff]  }
 0x530   :  { %v835_v52 = vpack.c.bf16 %v829_v51, %v829_v51  ;;  %v1613_v51 = vld [vmem:[#allocation5 + $0x4] ss:$16 sps:$4 sm:$0xff]  }
 0x532   :  { %869 = vmatmul.mubr.bf16.vlgmr.msra.gmra.mxu0 %v835_v52  ;;  %910 = vmatmul.mubr.bf16.vlgmr.msra.gmra.mxu1 %v835_v52  ;;  %v1614_v52 = vld [vmem:[#allocation5 + $0xc] ss:$16 sps:$4 sm:$0xff]  }
 0x533   :  { %953 = vmatpush1.bf16.msra.mxu0 %v1754_v2  ;;  %994 = vmatpush1.bf16.msra.mxu1 %v1767_v7  ;;  %v1586_v2 = vld [vmem:[#allocation5 + $0xe4] ss:$16 sps:$4 sm:$0xff]   ;;  %v832_v7 = vld [vmem:[#allocation2 + $0xa8] sm:$0xff] }
 0x534   :  { %954 = vmatprep.subr.bf16.mxu0 %v1757_v3  ;;  %995 = vmatprep.subr.bf16.mxu1 %v1777_v10  ;;  %v831_v3 = vld [vmem:[#allocation2 + $0xa0] sm:$0xff] }
 0x535   :  { %984 = vmatprep.mubr.bf16.mxu0 %v1712_v0  ;;  %1025 = vmatprep.mubr.bf16.mxu1 %v1712_v0 }
 0x537   :  { %955 = vmatpush1.bf16.msra.mxu0 %v1760_v4  ;;  %996 = vmatpush1.bf16.msra.mxu1 %v1779_v11 }
 0x538   :  { %956 = vmatprep.subr.bf16.mxu0 %v1763_v5  ;;  %997 = vmatprep.subr.bf16.mxu1 %v1787_v14 }
 0x53b   :  { %957 = vmatpush1.bf16.msra.mxu0 %v1770_v8  ;;  %998 = vmatpush1.bf16.msra.mxu1 %v1791_v15 }
 0x53c   :  { %958 = vmatprep.subr.bf16.mxu0 %v1774_v9  ;;  %999 = vmatprep.subr.bf16.mxu1 %v1794_v16 }
 0x53f   :  { %959 = vmatpush1.bf16.msra.mxu0 %v1783_v12  ;;  %1000 = vmatpush1.bf16.msra.mxu1 %v1803_v19 }
 0x540   :  { %960 = vmatprep.subr.bf16.mxu0 %v1785_v13  ;;  %1001 = vmatprep.subr.bf16.mxu1 %v1806_v20  ;;  %v833_v20 = vld [vmem:[#allocation2 + $0xb0] sm:$0xff] }
 0x543   :  { %961 = vmatpush1.bf16.msra.mxu0 %v1797_v17  ;;  %1002 = vmatpush1.bf16.msra.mxu1 %v1815_v23 }
 0x544   :  { %962 = vmatprep.subr.bf16.mxu0 %v1800_v18  ;;  %1003 = vmatprep.subr.bf16.mxu1 %v1818_v24  ;;  %v834_v18 = vld [vmem:[#allocation2 + $0xb8] sm:$0xff] }
 0x547   :  { %963 = vmatpush1.bf16.msra.mxu0 %v1809_v21  ;;  %1004 = vmatpush1.bf16.msra.mxu1 %v1827_v27 }
 0x548   :  { %964 = vmatprep.subr.bf16.mxu0 %v1811_v22  ;;  %1005 = vmatprep.subr.bf16.mxu1 %v1830_v28 }
 0x54b   :  { %965 = vmatpush1.bf16.msra.mxu0 %v1821_v25  ;;  %1006 = vmatpush1.bf16.msra.mxu1 %v1837_v30 }
 0x54c   :  { %966 = vmatprep.subr.bf16.mxu0 %v1824_v26  ;;  %1007 = vmatprep.subr.bf16.mxu1 %v1840_v31 }
 0x54f   :  { %967 = vmatpush1.bf16.msra.mxu0 %v1833_v29  ;;  %1008 = vmatpush1.bf16.msra.mxu1 %v1844_v32 }
 0x550   :  { %1068 = vmatprep.subr.bf16.mxu0 %v1586_v2  ;;  %1109 = vmatprep.subr.bf16.mxu1 %v1765_v6  ;;  %v1615_v2 = vld [vmem:[#allocation5] ss:$16 sps:$4 sm:$0xff]  }
 0x5f2   :  { %v870_v4 = vpop.f32.mrf.mxu0  ;;  %v911_v5 = vpop.f32.mrf.mxu1 }
 0x5f3   :  { %v918_v8 = vadd.f32 %v870_v4, %v831_v3  ;;  %v920_v22 = vadd.f32 %v911_v5, %v833_v20  ;;  %v1616_v3 = vld [vmem:[#allocation5 + $0x8] ss:$16 sps:$4 sm:$0xff]   ;;  %v947_v4 = vld [vmem:[#allocation2 + $0xc0] sm:$0xff] }
 0x5f4   :  { %v872_v9 = vpop.f32.mrf.mxu0  ;;  %v913_v10 = vpop.f32.mrf.mxu1 }
 0x5f5   :  { %v1335_v11 = vmul.f32 -1.442695, %v918_v8  ;;  %v919_v12 = vadd.f32 %v872_v9, %v832_v7  ;;  %v921_v19 = vadd.f32 %v913_v10, %v834_v18  ;;  %v948_v8 = vld [vmem:[#allocation2 + $0xc8] sm:$0xff] }
 0x5f6   :  { %v874_v13 = vpop.f32.mrf.mxu0  ;;  %v915_v14 = vpop.f32.mrf.mxu1 }
 0x5f7   :  { %1538 = vpow2.f32 %v1335_v11  ;;  %v1336_v15 = vmul.f32 -1.442695, %v919_v12  ;;  %v1337_v6 = vmul.f32 -1.442695, %v921_v19  ;;  %v950_v19 = vld [vmem:[#allocation2 + $0xd8] sm:$0xff] }
 0x5f8   :  { %v875_v16 = vpop.f32.mrf.mxu0  ;;  %v916_v17 = vpop.f32.mrf.mxu1 }
 0x5f9   :  { %1540 = vpow2.f32 %v1336_v15 }
 0x5fa   :  { %1542 = vpow2.f32 %v1337_v6  ;;  %v949_v6 = vld [vmem:[#allocation2 + $0xd0] sm:$0xff] }
 0x604   :  { %v1539_v21 = vpop.eup %1538 }
 0x605   :  { %v928_v23 = vadd.f32 1.0, %v1539_v21 }
 0x606   :  { %v1541_v24 = vpop.eup %1540 }
 0x607   :  { %1544 = vrcp.f32 %v928_v23  ;;  %v929_v25 = vadd.f32 1.0, %v1541_v24  ;;  %v1543_v26 = vpop.eup %1542 }
 0x608   :  { %1546 = vtanh.f32 %v920_v22  ;;  %v938_v30 = vadd.f32 1.0, %v1543_v26 }
 0x609   :  { %1548 = vrcp.f32 %v929_v25 }
 0x60a   :  { %1550 = vrcp.f32 %v938_v30 }
 0x614   :  { %v1545_v27 = vpop.eup %1544 }
 0x615   :  { %v1547_v28 = vpop.eup %1546 }
 0x616   :  { %v1549_v29 = vpop.eup %1548  ;;  %v942_v31 = vmul.f32 %v1547_v28, %v1545_v27 }
 0x617   :  { %v941_v32 = vmul.f32 %v1549_v29, %v2038_v49  ;;  %v1551_v53 = vpop.eup %1550  ;;  %v1610_v49 = vld [vmem:[#allocation5 + $0x2c] ss:$16 sps:$4 sm:$0xff]  }
 0x619   :  { %v2075_v37 = vadd.f32 %v942_v31, %v941_v32 }
 0x61b   :  { %1552 = vtanh.f32 %v2075_v37 }
 0x628   :  { %v1553_v54 = vpop.eup %1552 }
 0x629   :  { %v945_v55 = vmul.f32 %v1553_v54, %v1551_v53 }
 0x62b   :  { %v951_v56 = vpack.c.bf16 %v945_v55, %v945_v55 }
 0x62d   :  { %985 = vmatmul.mubr.bf16.vlgmr.msra.gmra.mxu0 %v951_v56  ;;  %1026 = vmatmul.mubr.bf16.vlgmr.msra.gmra.mxu1 %v951_v56 }
 0x62e   :  { %1069 = vmatpush1.bf16.msra.mxu0 %v1587_v57  ;;  %1110 = vmatpush1.bf16.msra.mxu1 %v1588_v58 }
 0x62f   :  { %1070 = vmatprep.subr.bf16.mxu0 %v1589_v59  ;;  %1111 = vmatprep.subr.bf16.mxu1 %v1590_v60  ;;  %v1713_v59 = vmov 0.0   ;;  %v1193_v60 = vld [vmem:[#allocation7 + $0x78] sm:$0xff] }
 0x630   :  { %1100 = vmatprep.mubr.bf16.mxu0 %v1712_v0  ;;  %1141 = vmatprep.mubr.bf16.mxu1 %v1712_v0  ;;  %v1601_v0 = vld [vmem:[#allocation5 + $0x64] ss:$16 sps:$4 sm:$0xff]  }
 0x632   :  { %1071 = vmatpush1.bf16.msra.mxu0 %v1591_v61  ;;  %1112 = vmatpush1.bf16.msra.mxu1 %v1592_v62  ;;  %v1192_v61 = vld [vmem:[#allocation7 + $0x70] sm:$0xff]  ;;  %v1190_v62 = vld [vmem:[#allocation7 + $0x60] sm:$0xff] }
 0x633   :  { %1072 = vmatprep.subr.bf16.mxu0 %v1593_v33  ;;  %1113 = vmatprep.subr.bf16.mxu1 %v1594_v1  ;;  %v1189_v33 = vld [vmem:[#allocation7 + $0x58] sm:$0xff]  ;;  %v1188_v1 = vld [vmem:[#allocation7 + $0x50] sm:$0xff] }
 0x636   :  { %1073 = vmatpush1.bf16.msra.mxu0 %v1595_v34  ;;  %1114 = vmatpush1.bf16.msra.mxu1 %v1596_v35  ;;  %v1187_v34 = vld [vmem:[#allocation7 + $0x48] sm:$0xff]  ;;  %v1186_v35 = vld [vmem:[#allocation7 + $0x40] sm:$0xff] }
 0x637   :  { %1074 = vmatprep.subr.bf16.mxu0 %v1597_v36  ;;  %1115 = vmatprep.subr.bf16.mxu1 %v1598_v38  ;;  %v1185_v36 = vld [vmem:[#allocation7 + $0x38] sm:$0xff]  ;;  %v1184_v38 = vld [vmem:[#allocation7 + $0x30] sm:$0xff] }
 0x63a   :  { %1075 = vmatpush1.bf16.msra.mxu0 %v1599_v39  ;;  %1116 = vmatpush1.bf16.msra.mxu1 %v1600_v40  ;;  %v1183_v39 = vld [vmem:[#allocation7 + $0x28] sm:$0xff]  ;;  %v1182_v40 = vld [vmem:[#allocation7 + $0x20] sm:$0xff] }
 0x63b   :  { %1076 = vmatprep.subr.bf16.mxu0 %v1601_v0  ;;  %1117 = vmatprep.subr.bf16.mxu1 %v1602_v41  ;;  %v1181_v0 = vld [vmem:[#allocation7 + $0x18] sm:$0xff]  ;;  %v1180_v41 = vld [vmem:[#allocation7 + $0x10] sm:$0xff] }
 0x63e   :  { %1077 = vmatpush1.bf16.msra.mxu0 %v1603_v42  ;;  %1118 = vmatpush1.bf16.msra.mxu1 %v1604_v43  ;;  %v1179_v42 = vld [vmem:[#allocation7 + $0x8] sm:$0xff]  ;;  %v1178_v43 = vld [vmem:[#allocation7] sm:$0xff] }
 0x63f   :  { %1078 = vmatprep.subr.bf16.mxu0 %v1605_v44  ;;  %1119 = vmatprep.subr.bf16.mxu1 %v1606_v45  ;;  %v1063_v44 = vld [vmem:[#allocation2 + $0xe0] sm:$0xff] }
 0x642   :  { %1079 = vmatpush1.bf16.msra.mxu0 %v1607_v46  ;;  %1120 = vmatpush1.bf16.msra.mxu1 %v1608_v47  ;;  %v1064_v47 = vld [vmem:[#allocation2 + $0xe8] sm:$0xff] }
 0x643   :  { %1080 = vmatprep.subr.bf16.mxu0 %v1609_v48  ;;  %1121 = vmatprep.subr.bf16.mxu1 %v1610_v49 }
 0x646   :  { %1081 = vmatpush1.bf16.msra.mxu0 %v1611_v63  ;;  %1122 = vmatpush1.bf16.msra.mxu1 %v1612_v50 }
 0x647   :  { %1082 = vmatprep.subr.bf16.mxu0 %v1613_v51  ;;  %1123 = vmatprep.subr.bf16.mxu1 %v1614_v52 }
 0x64a   :  { %1083 = vmatpush1.bf16.msra.mxu0 %v1615_v2  ;;  %1124 = vmatpush1.bf16.msra.mxu1 %v1616_v3 }
 0x64b   :  { %1362 = vmatprep.subr.mxu0 %v1713_v59 }
 0x6ed   :  { %v986_v5 = vpop.f32.mrf.mxu0  ;;  %v1027_v7 = vpop.f32.mrf.mxu1 }
 0x6ee   :  { %v1034_v9 = vadd.f32 %v986_v5, %v947_v4  ;;  %v1036_v23 = vadd.f32 %v1027_v7, %v949_v6  ;;  %v1066_v7 = vld [vmem:[#allocation2 + $0xf8] sm:$0xff] }
 0x6ef   :  { %v988_v10 = vpop.f32.mrf.mxu0  ;;  %v1029_v11 = vpop.f32.mrf.mxu1 }
 0x6f0   :  { %v1338_v12 = vmul.f32 -1.442695, %v1034_v9  ;;  %v1035_v13 = vadd.f32 %v988_v10, %v948_v8  ;;  %v1037_v20 = vadd.f32 %v1029_v11, %v950_v19  ;;  %v1065_v9 = vld [vmem:[#allocation2 + $0xf0] sm:$0xff] }
 0x6f1   :  { %v990_v14 = vpop.f32.mrf.mxu0  ;;  %v1031_v15 = vpop.f32.mrf.mxu1 }
 0x6f2   :  { %1554 = vpow2.f32 %v1338_v12  ;;  %v1339_v16 = vmul.f32 -1.442695, %v1035_v13  ;;  %v1340_v21 = vmul.f32 -1.442695, %v1037_v20 }
 0x6f3   :  { %v991_v17 = vpop.f32.mrf.mxu0  ;;  %v1032_v18 = vpop.f32.mrf.mxu1 }
 0x6f4   :  { %1556 = vpow2.f32 %v1339_v16 }
 0x6f5   :  { %1558 = vpow2.f32 %v1340_v21 }
 0x6ff   :  { %v1555_v22 = vpop.eup %1554 }
 0x700   :  { %v1044_v24 = vadd.f32 1.0, %v1555_v22 }
 0x701   :  { %v1557_v25 = vpop.eup %1556 }
 0x702   :  { %1560 = vrcp.f32 %v1044_v24  ;;  %v1045_v26 = vadd.f32 1.0, %v1557_v25  ;;  %v1559_v27 = vpop.eup %1558 }
 0x703   :  { %1562 = vtanh.f32 %v1036_v23  ;;  %v1054_v31 = vadd.f32 1.0, %v1559_v27 }
 0x704   :  { %1564 = vrcp.f32 %v1045_v26  ;;  %v1344_v26 = vld [vmem:[%s2094_s3] ss:$0 sm:$0xff] }
 0x705   :  { %1566 = vrcp.f32 %v1054_v31 }
 0x70f   :  { %v1561_v28 = vpop.eup %1560 }
 0x710   :  { %v1563_v29 = vpop.eup %1562 }
 0x711   :  { %v1565_v30 = vpop.eup %1564  ;;  %v1058_v32 = vmul.f32 %v1563_v29, %v1561_v28 }
 0x712   :  { %v1057_v53 = vmul.f32 %v1565_v30, %v2075_v37  ;;  %v1567_v55 = vpop.eup %1566  ;;  %v1191_v37 = vld [vmem:[#allocation7 + $0x68] sm:$0xff] }
 0x714   :  { %v2081_v54 = vadd.f32 %v1058_v32, %v1057_v53 }
 0x716   :  { %1568 = vtanh.f32 %v2081_v54 }
 0x723   :  { %v1569_v56 = vpop.eup %1568 }
 0x724   :  { %v1061_v57 = vmul.f32 %v1569_v56, %v1567_v55 }
 0x726   :  { %v1067_v58 = vpack.c.bf16 %v1061_v57, %v1061_v57 }
 0x728   :  { %1101 = vmatmul.mubr.bf16.vlgmr.msra.gmra.mxu0 %v1067_v58  ;;  %1142 = vmatmul.mubr.bf16.vlgmr.msra.gmra.mxu1 %v1067_v58 }
 0x729   :  { %1363 = vmatpush3.msra.mxu0 %v1193_v60  ;;  %1394 = vmatprep.mubr.msk.f32.mxu0 %vm1714_vm0, %v1713_v59 }
 0x72a   :  { %1364 = vmatprep.subr.mxu0 %v1713_v59 }
 0x72b   :  { %1365 = vmatpush3.msra.mxu0 %v1192_v61 }
 0x72c   :  { %1366 = vmatprep.subr.mxu0 %v1713_v59 }
 0x72d   :  { %1367 = vmatpush3.msra.mxu0 %v1191_v37 }
 0x72e   :  { %1368 = vmatprep.subr.mxu0 %v1713_v59 }
 0x72f   :  { %1369 = vmatpush3.msra.mxu0 %v1190_v62 }
 0x730   :  { %1370 = vmatprep.subr.mxu0 %v1713_v59 }
 0x731   :  { %1371 = vmatpush3.msra.mxu0 %v1189_v33 }
 0x732   :  { %1372 = vmatprep.subr.mxu0 %v1713_v59 }
 0x733   :  { %1373 = vmatpush3.msra.mxu0 %v1188_v1 }
 0x734   :  { %1374 = vmatprep.subr.mxu0 %v1713_v59 }
 0x735   :  { %1375 = vmatpush3.msra.mxu0 %v1187_v34 }
 0x736   :  { %1376 = vmatprep.subr.mxu0 %v1713_v59 }
 0x737   :  { %1377 = vmatpush3.msra.mxu0 %v1186_v35 }
 0x738   :  { %1378 = vmatprep.subr.mxu0 %v1713_v59 }
 0x739   :  { %1379 = vmatpush3.msra.mxu0 %v1185_v36 }
 0x73a   :  { %1380 = vmatprep.subr.mxu0 %v1713_v59 }
 0x73b   :  { %1381 = vmatpush3.msra.mxu0 %v1184_v38 }
 0x73c   :  { %1382 = vmatprep.subr.mxu0 %v1713_v59 }
 0x73d   :  { %1383 = vmatpush3.msra.mxu0 %v1183_v39 }
 0x73e   :  { %1384 = vmatprep.subr.mxu0 %v1713_v59 }
 0x73f   :  { %1385 = vmatpush3.msra.mxu0 %v1182_v40 }
 0x740   :  { %1386 = vmatprep.subr.mxu0 %v1713_v59 }
 0x741   :  { %1387 = vmatpush3.msra.mxu0 %v1181_v0 }
 0x742   :  { %1388 = vmatprep.subr.mxu0 %v1713_v59 }
 0x743   :  { %1389 = vmatpush3.msra.mxu0 %v1180_v41 }
 0x744   :  { %1390 = vmatprep.subr.mxu0 %v1713_v59 }
 0x745   :  { %1391 = vmatpush3.msra.mxu0 %v1179_v42 }
 0x746   :  { %1392 = vmatprep.subr.mxu0 %v1713_v59 }
 0x747   :  { %1393 = vmatpush3.msra.mxu0 %v1178_v43 }
 0x7e8   :  { %v1102_v45 = vpop.f32.mrf.mxu0  ;;  %v1143_v46 = vpop.f32.mrf.mxu1 }
 0x7e9   :  { %v1150_v48 = vadd.f32 %v1102_v45, %v1063_v44  ;;  %v1152_v12 = vadd.f32 %v1143_v46, %v1065_v9 }
 0x7ea   :  { %v1104_v49 = vpop.f32.mrf.mxu0  ;;  %v1145_v63 = vpop.f32.mrf.mxu1 }
 0x7eb   :  { %v1341_v50 = vmul.f32 -1.442695, %v1150_v48  ;;  %v1151_v51 = vadd.f32 %v1104_v49, %v1064_v47  ;;  %v1153_v8 = vadd.f32 %v1145_v63, %v1066_v7 }
 0x7ec   :  { %v1106_v52 = vpop.f32.mrf.mxu0  ;;  %v1147_v2 = vpop.f32.mrf.mxu1 }
 0x7ed   :  { %1570 = vpow2.f32 %v1341_v50  ;;  %v1342_v3 = vmul.f32 -1.442695, %v1151_v51  ;;  %v1343_v10 = vmul.f32 -1.442695, %v1153_v8 }
 0x7ee   :  { %v1107_v4 = vpop.f32.mrf.mxu0  ;;  %v1148_v5 = vpop.f32.mrf.mxu1 }
 0x7ef   :  { %1572 = vpow2.f32 %v1342_v3 }
 0x7f0   :  { %1574 = vpow2.f32 %v1343_v10 }
 0x7fa   :  { %v1571_v11 = vpop.eup %1570 }
 0x7fb   :  { %v1160_v13 = vadd.f32 1.0, %v1571_v11 }
 0x7fc   :  { %v1573_v14 = vpop.eup %1572 }
 0x7fd   :  { %1576 = vrcp.f32 %v1160_v13  ;;  %v1161_v15 = vadd.f32 1.0, %v1573_v14  ;;  %v1575_v16 = vpop.eup %1574 }
 0x7fe   :  { %1578 = vtanh.f32 %v1152_v12  ;;  %v1170_v20 = vadd.f32 1.0, %v1575_v16 }
 0x7ff   :  { %1580 = vrcp.f32 %v1161_v15 }
 0x800   :  { %1582 = vrcp.f32 %v1170_v20 }
 0x80a   :  { %v1577_v17 = vpop.eup %1576 }
 0x80b   :  { %v1579_v18 = vpop.eup %1578 }
 0x80c   :  { %v1581_v19 = vpop.eup %1580  ;;  %v1174_v6 = vmul.f32 %v1579_v18, %v1577_v17 }
 0x80d   :  { %v1173_v21 = vmul.f32 %v1581_v19, %v2081_v54  ;;  %v1583_v23 = vpop.eup %1582 }
 0x80f   :  { %v1175_v22 = vadd.f32 %v1174_v6, %v1173_v21 }
 0x811   :  { %1584 = vtanh.f32 %v1175_v22 }
 0x81e   :  { %v1585_v24 = vpop.eup %1584 }
 0x81f   :  { %v1177_v25 = vmul.f32 %v1585_v24, %v1583_v23 }
 0x821   :  { %1395 = vmatmul.mubr.f32.vlgmr.msra.gmra.mxu0 %v1177_v25 }
 0x8e1   :  { %v1267_v27 = vpop.f32.mrf.mxu0 }
 0x8e2   :  { %v1268_v28 = vadd.f32 %v1344_v26, %v1267_v27 }
 0x8e3   :  { %v1396_v29 = vpop.f32.mrf.mxu0 }
 0x8e4   :  { %1271 = vst [vmem:[#allocation8] sm:$0xff] %v1268_v28 }
 0x8e5   :  { %1688 = shalt.err (!%p1685_p5)
}
 0x8e6   :  { %1281 = dma.vmem_to_hbm [thread:$0]  %s1279_s10, 128, %s2095_s4, [#allocation4]  }
 0x8e7   :  { %1701 = dma.done.wait [#allocation4], 128  }
 0x8e8   :  { %1702 = vsyncadd [#allocation4], 4294967168 }
 0x8e9   :  { %1285 = vsyncpa [#allocation3], 1 }
 0x8ea   :  { %1286 = vsyncpa [#allocation6], 1 }
 0x8eb   :  { %1287 = vsyncpa [#allocation4], 1 }

</bundles_post_ra>
